<compile_context>
chip_gen: v5e
topology: v5e:2x2
jax: 0.10.0
libtpu: 0.0.40
codegen_flags: <defaults>
</compile_context>

<pallas_src>
import math

import jax
import jax.numpy as jnp
from jax.experimental import pallas as pl
from jax.experimental.pallas import tpu as pltpu


def _round_up(x, m):
    return ((x + m - 1) // m) * m


# ----------------------------------------------------------------------------
# Fused decoder kernel: grid step i < n_layers  -> LSTM layer i
#                       grid step i >= n_layers -> fc-head output tile (i - n_layers)
# ----------------------------------------------------------------------------
def _make_decoder_kernel(n_layers, e_pad, h_pad, k_in, b_pad):
    def kernel(ids_ref,        # SMEM [b_pad] int32        (scalar prefetch)
               emb_hbm,        # HBM  [V, 1, E_pad] f32    (memory_space=ANY)
               h0_ref,         # VMEM [1, b_pad, H_pad] f32   (layer block)
               c0_ref,         # VMEM [1, b_pad, H_pad] f32   (layer block)
               w_ref,          # VMEM [1, K_pad, 4*H_pad] bf16 (layer block)
               b_ref,          # VMEM [1, 1, 4*H_pad] f32     (layer block)
               fcw_ref,        # VMEM [H_pad, TO] bf16        (fc O-tile)
               fcb_ref,        # VMEM [1, TO] f32             (fc O-tile)
               pred_ref,       # VMEM [b_pad, TO] f32         (fc O-tile)
               h_out_ref,      # VMEM [1, b_pad, H_pad] f32   (layer block)
               c_out_ref,      # VMEM [1, b_pad, H_pad] f32   (layer block)
               xh_scr,         # VMEM [b_pad, K_in + H_pad] bf16 (persistent [x|h])
               emb_stage,      # VMEM [b_pad, E_pad] f32      (gather staging)
               sem):           # DMA semaphores (b_pad,)
        step = pl.program_id(0)

        # ---- step 0: fused embedding gather (HBM row DMAs, all in flight) ----
        @pl.when(step == 0)
        def _():
            xh_scr[...] = jnp.zeros_like(xh_scr)
            for b in range(b_pad):
                pltpu.make_async_copy(emb_hbm.at[ids_ref[b]],
                                      emb_stage.at[pl.ds(b, 1), :],
                                      sem.at[b]).start()
            for b in range(b_pad):
                pltpu.make_async_copy(emb_hbm.at[ids_ref[b]],
                                      emb_stage.at[pl.ds(b, 1), :],
                                      sem.at[b]).wait()
            # dropout(embedded) = identity in eval mode.
            xh_scr[:, :e_pad] = emb_stage[...].astype(xh_scr.dtype)

        # ---- LSTM layer phase: single fused [x|h] @ [W_ih; W_hh] matmul ----
        @pl.when(step < n_layers)
        def _():
            xh_scr[:, k_in:] = h0_ref[0].astype(xh_scr.dtype)
            gates = (jnp.dot(xh_scr[...], w_ref[0],
                             preferred_element_type=jnp.float32)
                     + b_ref[0])                           # [b_pad, 4*H_pad]

            # PyTorch gate order (i, f, g, o); each block is 128-lane aligned.
            i_g = jax.nn.sigmoid(gates[:, 0 * h_pad:1 * h_pad])
            f_g = jax.nn.sigmoid(gates[:, 1 * h_pad:2 * h_pad])
            g_g = jnp.tanh(gates[:, 2 * h_pad:3 * h_pad])
            o_g = jax.nn.sigmoid(gates[:, 3 * h_pad:4 * h_pad])

            c_new = f_g * c0_ref[0] + i_g * g_g
            h_new = o_g * jnp.tanh(c_new)

            h_out_ref[0] = h_new
            c_out_ref[0] = c_new
            # input to the next layer (inter-layer dropout = identity in eval).
            xh_scr[:, :h_pad] = h_new.astype(xh_scr.dtype)

        # ---- fc head phase: one streamed, lane-dense O-tile per grid step ----
        @pl.when(step >= n_layers)
        def _():
            pred_ref[...] = (jnp.dot(xh_scr[:, :h_pad], fcw_ref[...],
                                     preferred_element_type=jnp.float32)
                             + fcb_ref[...])
    return kernel


# ----------------------------------------------------------------------------
# Parameter construction (PyTorch convention) + one-time pad/transpose/cast prep
# ----------------------------------------------------------------------------
def init_decoder_params(key, output_dim, emb_dim, hid_dim, n_layers):
    keys = jax.random.split(key, 3 + 4 * n_layers)
    k = 1.0 / math.sqrt(hid_dim)

    params = {"embedding": jax.random.normal(keys[0], (output_dim, emb_dim),
                                             jnp.float32)}
    layers = []
    for l in range(n_layers):
        in_dim = emb_dim if l == 0 else hid_dim
        kw = keys[3 + 4 * l: 3 + 4 * (l + 1)]
        w_ih = jax.random.uniform(kw[0], (4 * hid_dim, in_dim), jnp.float32, -k, k)
        w_hh = jax.random.uniform(kw[1], (4 * hid_dim, hid_dim), jnp.float32, -k, k)
        b_ih = jax.random.uniform(kw[2], (4 * hid_dim,), jnp.float32, -k, k)
        b_hh = jax.random.uniform(kw[3], (4 * hid_dim,), jnp.float32, -k, k)
        layers.append((w_ih, w_hh, b_ih + b_hh))   # biases pre-summed (identical math)
    params["lstm"] = layers

    params["fc_w"] = jax.random.uniform(keys[1], (output_dim, hid_dim),
                                        jnp.float32, -k, k)
    params["fc_b"] = jax.random.uniform(keys[2], (output_dim,), jnp.float32, -k, k)
    return params


def _pad_gate_rows(w, hid_dim, h_pad):
    """[4H, K] -> [4*H_pad, K], zero-padding each (i,f,g,o) row block separately."""
    w4 = w.reshape(4, hid_dim, w.shape[1])
    w4 = jnp.pad(w4, ((0, 0), (0, h_pad - hid_dim), (0, 0)))
    return w4.reshape(4 * h_pad, w.shape[1])


def prepare_decoder_params(raw, output_dim, emb_dim, hid_dim, fc_tile=512):
    """One-time prep: pad to (8,128)-friendly shapes, fuse/stack/transpose weights,
    cast matmul weights to bf16."""
    e_pad = _round_up(emb_dim, 128)
    h_pad = _round_up(hid_dim, 128)
    o_pad = _round_up(output_dim, 128)
    k_in = max(e_pad, h_pad)           # padded width of the x-part of [x | h]
    k_pad = k_in + h_pad

    # fc head O-tile width: largest 128-multiple divisor of O_pad up to fc_tile.
    to = min(o_pad, _round_up(fc_tile, 128))
    while o_pad % to:
        to -= 128

    # Embedding stays in HBM; [V, 1, E_pad] f32 so each gathered row is a 2-D
    # (1, E_pad) DMA block (only b_pad rows are fetched per step, dtype immaterial).
    emb = jnp.pad(raw["embedding"], ((0, 0), (0, e_pad - emb_dim)))
    emb = emb.reshape(output_dim, 1, e_pad)

    w_blocks, b_blocks = [], []
    for l, (w_ih, w_hh, b) in enumerate(raw["lstm"]):
        in_dim = emb_dim if l == 0 else hid_dim
        w_ih_t = jnp.pad(_pad_gate_rows(w_ih, hid_dim, h_pad),
                         ((0, 0), (0, k_in - in_dim))).T        # [K_in, 4*H_pad]
        w_hh_t = jnp.pad(_pad_gate_rows(w_hh, hid_dim, h_pad),
                         ((0, 0), (0, h_pad - hid_dim))).T      # [H_pad, 4*H_pad]
        w_blocks.append(jnp.concatenate([w_ih_t, w_hh_t], axis=0))  # [K_pad, 4*H_pad]
        b_blocks.append(jnp.pad(b.reshape(4, hid_dim),
                                ((0, 0), (0, h_pad - hid_dim))).reshape(1, 4 * h_pad))

    w_stack = jnp.stack(w_blocks).astype(jnp.bfloat16)   # [L, K_pad, 4*H_pad] bf16
    b_stack = jnp.stack(b_blocks)                        # [L, 1, 4*H_pad]    f32

    fc_w_t = jnp.pad(raw["fc_w"], ((0, o_pad - output_dim),
                                   (0, h_pad - hid_dim))).T.astype(jnp.bfloat16)
    fc_b = jnp.pad(raw["fc_b"], (0, o_pad - output_dim)).reshape(1, o_pad)

    return {"embedding": emb, "w_stack": w_stack, "b_stack": b_stack,
            "fc_w_t": fc_w_t, "fc_b": fc_b,
            "dims": {"output_dim": output_dim, "emb_dim": emb_dim,
                     "hid_dim": hid_dim, "E_pad": e_pad, "H_pad": h_pad,
                     "O_pad": o_pad, "K_in": k_in, "K_pad": k_pad, "TO": to}}


# ----------------------------------------------------------------------------
# Decoder forward (matches the PyTorch module semantics, eval-mode dropout)
# ----------------------------------------------------------------------------
def decoder_forward(params, input_ids, hidden, cell):
    """input_ids: int32 [B]; hidden, cell: float32 [n_layers, B, H].
    Returns (prediction [B, output_dim], hidden, cell) like Decoder.forward."""
    dims = params["dims"]
    n_layers = params["w_stack"].shape[0]
    B = input_ids.shape[0]
    H, O = dims["hid_dim"], dims["output_dim"]
    e_pad, h_pad, o_pad = dims["E_pad"], dims["H_pad"], dims["O_pad"]
    k_in, k_pad, to = dims["K_in"], dims["K_pad"], dims["TO"]
    b_pad = max(8, _round_up(B, 8))
    n_fc = o_pad // to

    ids_pad = jnp.pad(input_ids.astype(jnp.int32), (0, b_pad - B))
    h_in = jnp.pad(hidden, ((0, 0), (0, b_pad - B), (0, h_pad - H)))
    c_in = jnp.pad(cell, ((0, 0), (0, b_pad - B), (0, h_pad - H)))

    # Grid step -> (layer block | fc O-tile) index maps (clamped to stay in range;
    # clamped == previous index => no redundant DMA during the other phase).
    layer_idx = lambda i, ids: (jnp.minimum(i, n_layers - 1), 0, 0)
    fc_idx = lambda i, ids: (0, jnp.maximum(i - n_layers, 0))

    grid_spec = pltpu.PrefetchScalarGridSpec(
        num_scalar_prefetch=1,                 # token ids -> SMEM
        grid=(n_layers + n_fc,),
        in_specs=[
            pl.BlockSpec(memory_space=pl.ANY),             # embedding table (HBM)
            pl.BlockSpec((1, b_pad, h_pad), layer_idx),    # h0 (per layer)
            pl.BlockSpec((1, b_pad, h_pad), layer_idx),    # c0 (per layer)
            pl.BlockSpec((1, k_pad, 4 * h_pad), layer_idx),  # fused LSTM weights
            pl.BlockSpec((1, 1, 4 * h_pad), layer_idx),    # LSTM bias
            pl.BlockSpec((h_pad, to), fc_idx),             # fc weight O-tile
            pl.BlockSpec((1, to), fc_idx),                 # fc bias O-tile
        ],
        out_specs=(
            pl.BlockSpec((b_pad, to), fc_idx),             # prediction O-tile
            pl.BlockSpec((1, b_pad, h_pad), layer_idx),    # new hidden (per layer)
            pl.BlockSpec((1, b_pad, h_pad), layer_idx),    # new cell   (per layer)
        ),
        scratch_shapes=[
            pltpu.VMEM((b_pad, k_pad), jnp.bfloat16),      # persistent [x | h]
            pltpu.VMEM((b_pad, e_pad), jnp.float32),       # embedding gather staging
            pltpu.SemaphoreType.DMA((b_pad,)),
        ],
    )

    pred_p, h_out_p, c_out_p = pl.pallas_call(
        _make_decoder_kernel(n_layers, e_pad, h_pad, k_in, b_pad),
        out_shape=(jax.ShapeDtypeStruct((b_pad, o_pad), jnp.float32),
                   jax.ShapeDtypeStruct((n_layers, b_pad, h_pad), jnp.float32),
                   jax.ShapeDtypeStruct((n_layers, b_pad, h_pad), jnp.float32)),
        grid_spec=grid_spec,
        compiler_params=pltpu.CompilerParams(
            dimension_semantics=("arbitrary",),
            vmem_limit_bytes=32 * 1024 * 1024),
    )(ids_pad, params["embedding"], h_in, c_in,
      params["w_stack"], params["b_stack"], params["fc_w_t"], params["fc_b"])

    return pred_p[:B, :O], h_out_p[:, :B, :H], c_out_p[:, :B, :H]


# ----------------------------------------------------------------------------
# Pure-JAX reference (unpadded, PyTorch-convention f32 weights)
# ----------------------------------------------------------------------------
def decoder_forward_ref(raw, input_ids, hidden, cell):
    hp = jax.lax.Precision.HIGHEST
    H = hidden.shape[-1]
    x = raw["embedding"][input_ids]
    new_h, new_c = [], []
    for l, (w_ih, w_hh, b) in enumerate(raw["lstm"]):
        gates = (jnp.dot(x, w_ih.T, precision=hp)
                 + jnp.dot(hidden[l], w_hh.T, precision=hp) + b)
        i_g = jax.nn.sigmoid(gates[:, 0 * H:1 * H])
        f_g = jax.nn.sigmoid(gates[:, 1 * H:2 * H])
        g_g = jnp.tanh(gates[:, 2 * H:3 * H])
        o_g = jax.nn.sigmoid(gates[:, 3 * H:4 * H])
        c_new = f_g * cell[l] + i_g * g_g
        h_new = o_g * jnp.tanh(c_new)
        new_h.append(h_new)
        new_c.append(c_new)
        x = h_new
    pred = jnp.dot(x, raw["fc_w"].T, precision=hp) + raw["fc_b"]
    return pred, jnp.stack(new_h), jnp.stack(new_c)


# ----------------------------------------------------------------------------
if __name__ == "__main__":
    OUTPUT_DIM = 32   # vocab size
    EMB_DIM = 16
    HID_DIM = 32
    N_LAYERS = 2
    BATCH = 2

    key = jax.random.PRNGKey(0)
    k_par, k_in_, k_h, k_c = jax.random.split(key, 4)

    raw = init_decoder_params(k_par, OUTPUT_DIM, EMB_DIM, HID_DIM, N_LAYERS)
    params = prepare_decoder_params(raw, OUTPUT_DIM, EMB_DIM, HID_DIM)

    input_ids = jax.random.randint(k_in_, (BATCH,), 0, OUTPUT_DIM, jnp.int32)
    hidden = jax.random.normal(k_h, (N_LAYERS, BATCH, HID_DIM), jnp.float32)
    cell = jax.random.normal(k_c, (N_LAYERS, BATCH, HID_DIM), jnp.float32)

    prediction, hidden_out, cell_out = decoder_forward(
        params, input_ids, hidden, cell)
    jax.block_until_ready((prediction, hidden_out, cell_out))

    assert prediction.shape == (BATCH, OUTPUT_DIM)
    assert hidden_out.shape == (N_LAYERS, BATCH, HID_DIM)
    assert cell_out.shape == (N_LAYERS, BATCH, HID_DIM)

    pred_ref, h_ref, c_ref = decoder_forward_ref(raw, input_ids, hidden, cell)
    assert jnp.allclose(prediction, pred_ref, atol=2e-2, rtol=0)
    assert jnp.allclose(hidden_out, h_ref, atol=2e-2, rtol=0)
    assert jnp.allclose(cell_out, c_ref, atol=2e-2, rtol=0)

    print("KERNEL_OK")
</pallas_src>

<mosaic_0001>
module attributes {stable_mosaic.version = 11 : i64} {
  func.func @kernel(%arg0: i32, %arg1: memref<8xi32, #tpu.memory_space<smem>>, %arg2: memref<32x1x128xf32, #tpu.memory_space<any>>, %arg3: memref<1x8x128xf32, #tpu.memory_space<vmem>>, %arg4: memref<1x8x128xf32, #tpu.memory_space<vmem>>, %arg5: memref<1x256x512xbf16, #tpu.memory_space<vmem>>, %arg6: memref<1x1x512xf32, #tpu.memory_space<vmem>>, %arg7: memref<128x128xbf16, #tpu.memory_space<vmem>>, %arg8: memref<1x128xf32, #tpu.memory_space<vmem>>, %arg9: memref<8x128xf32, #tpu.memory_space<vmem>>, %arg10: memref<1x8x128xf32, #tpu.memory_space<vmem>>, %arg11: memref<1x8x128xf32, #tpu.memory_space<vmem>>, %arg12: memref<8x256xbf16, #tpu.memory_space<vmem>>, %arg13: memref<8x128xf32, #tpu.memory_space<vmem>>, %arg14: memref<8x!tpu.dma_semaphore, #tpu.memory_space<semaphore_mem>>) attributes {dimension_semantics = [#tpu.dimension_semantics<arbitrary>], iteration_bounds = array<i64: 3>, scalar_prefetch = 1 : i64, scratch_operands = 3 : i64, tpu.core_type = #tpu.core_type<tc>, window_params = [{}, {transform_indices = @transform_1, window_bounds = array<i64: 1, 8, 128>}, {transform_indices = @transform_2, window_bounds = array<i64: 1, 8, 128>}, {transform_indices = @transform_3, window_bounds = array<i64: 1, 256, 512>}, {transform_indices = @transform_4, window_bounds = array<i64: 1, 1, 512>}, {transform_indices = @transform_5, window_bounds = array<i64: 128, 128>}, {transform_indices = @transform_6, window_bounds = array<i64: 1, 128>}, {transform_indices = @transform_7, window_bounds = array<i64: 8, 128>}, {transform_indices = @transform_8, window_bounds = array<i64: 1, 8, 128>}, {transform_indices = @transform_9, window_bounds = array<i64: 1, 8, 128>}]} {
    %c0_i32 = arith.constant 0 : i32
    %0 = arith.cmpi eq, %arg0, %c0_i32 : i32
    %1 = arith.extui %0 : i1 to i32
    %c0_i32_0 = arith.constant 0 : i32
    %2 = arith.cmpi ne, %1, %c0_i32_0 : i32
    scf.if %2 {
      %cst = arith.constant 0.000000e+00 : bf16
      %9 = vector.broadcast %cst : bf16 to vector<8x256xbf16>
      %c0 = arith.constant 0 : index
      %c0_4 = arith.constant 0 : index
      %10 = vector.load %arg12[%c0, %c0_4] : memref<8x256xbf16, #tpu.memory_space<vmem>>, vector<8x256xbf16>
      tpu.vector_store %arg12[%c0, %c0_4], %9 {strides = array<i32>} : memref<8x256xbf16, #tpu.memory_space<vmem>>, vector<8x256xbf16>,
      %c0_5 = arith.constant 0 : index
      %11 = memref.load %arg1[%c0_5] : memref<8xi32, #tpu.memory_space<smem>>
      %c0_i32_6 = arith.constant 0 : i32
      %c0_i32_7 = arith.constant 0 : i32
      %c0_i32_8 = arith.constant 0 : i32
      %12 = tpu.memref_slice %arg2[%11, %c0_i32_7, %c0_i32_8] : memref<32x1x128xf32, #tpu.memory_space<any>> -> memref<1x1x128xf32, #tpu.memory_space<any>>
      %13 = tpu.memref_squeeze %12 : memref<1x1x128xf32, #tpu.memory_space<any>> -> memref<1x128xf32, #tpu.memory_space<any>>
      %c0_i32_9 = arith.constant 0 : i32
      %c0_i32_10 = arith.constant 0 : i32
      %14 = tpu.memref_slice %arg13[%c0_i32_9, %c0_i32_10] : memref<8x128xf32, #tpu.memory_space<vmem>> -> memref<1x128xf32, #tpu.memory_space<vmem>>
      %15 = tpu.memref_slice %arg14[%c0_i32_6] : memref<8x!tpu.dma_semaphore, #tpu.memory_space<semaphore_mem>> -> memref<1x!tpu.dma_semaphore, #tpu.memory_space<semaphore_mem>>
      %16 = tpu.memref_squeeze %15 : memref<1x!tpu.dma_semaphore, #tpu.memory_space<semaphore_mem>> -> memref<!tpu.dma_semaphore, #tpu.memory_space<semaphore_mem>>
      tpu.enqueue_dma source(%13 : memref<1x128xf32, #tpu.memory_space<any>>) target(%14 : memref<1x128xf32, #tpu.memory_space<vmem>>) target_semaphore(%16 : memref<!tpu.dma_semaphore, #tpu.memory_space<semaphore_mem>>)
      %c1 = arith.constant 1 : index
      %17 = memref.load %arg1[%c1] : memref<8xi32, #tpu.memory_space<smem>>
      %c1_i32 = arith.constant 1 : i32
      %c0_i32_11 = arith.constant 0 : i32
      %c0_i32_12 = arith.constant 0 : i32
      %18 = tpu.memref_slice %arg2[%17, %c0_i32_11, %c0_i32_12] : memref<32x1x128xf32, #tpu.memory_space<any>> -> memref<1x1x128xf32, #tpu.memory_space<any>>
      %19 = tpu.memref_squeeze %18 : memref<1x1x128xf32, #tpu.memory_space<any>> -> memref<1x128xf32, #tpu.memory_space<any>>
      %c1_i32_13 = arith.constant 1 : i32
      %c0_i32_14 = arith.constant 0 : i32
      %20 = tpu.memref_slice %arg13[%c1_i32_13, %c0_i32_14] : memref<8x128xf32, #tpu.memory_space<vmem>> -> memref<1x128xf32, #tpu.memory_space<vmem>>
      %21 = tpu.memref_slice %arg14[%c1_i32] : memref<8x!tpu.dma_semaphore, #tpu.memory_space<semaphore_mem>> -> memref<1x!tpu.dma_semaphore, #tpu.memory_space<semaphore_mem>>
      %22 = tpu.memref_squeeze %21 : memref<1x!tpu.dma_semaphore, #tpu.memory_space<semaphore_mem>> -> memref<!tpu.dma_semaphore, #tpu.memory_space<semaphore_mem>>
      tpu.enqueue_dma source(%19 : memref<1x128xf32, #tpu.memory_space<any>>) target(%20 : memref<1x128xf32, #tpu.memory_space<vmem>>) target_semaphore(%22 : memref<!tpu.dma_semaphore, #tpu.memory_space<semaphore_mem>>)
      %c2 = arith.constant 2 : index
      %23 = memref.load %arg1[%c2] : memref<8xi32, #tpu.memory_space<smem>>
      %c2_i32_15 = arith.constant 2 : i32
      %c0_i32_16 = arith.constant 0 : i32
      %c0_i32_17 = arith.constant 0 : i32
      %24 = tpu.memref_slice %arg2[%23, %c0_i32_16, %c0_i32_17] : memref<32x1x128xf32, #tpu.memory_space<any>> -> memref<1x1x128xf32, #tpu.memory_space<any>>
      %25 = tpu.memref_squeeze %24 : memref<1x1x128xf32, #tpu.memory_space<any>> -> memref<1x128xf32, #tpu.memory_space<any>>
      %c2_i32_18 = arith.constant 2 : i32
      %c0_i32_19 = arith.constant 0 : i32
      %26 = tpu.memref_slice %arg13[%c2_i32_18, %c0_i32_19] : memref<8x128xf32, #tpu.memory_space<vmem>> -> memref<1x128xf32, #tpu.memory_space<vmem>>
      %27 = tpu.memref_slice %arg14[%c2_i32_15] : memref<8x!tpu.dma_semaphore, #tpu.memory_space<semaphore_mem>> -> memref<1x!tpu.dma_semaphore, #tpu.memory_space<semaphore_mem>>
      %28 = tpu.memref_squeeze %27 : memref<1x!tpu.dma_semaphore, #tpu.memory_space<semaphore_mem>> -> memref<!tpu.dma_semaphore, #tpu.memory_space<semaphore_mem>>
      tpu.enqueue_dma source(%25 : memref<1x128xf32, #tpu.memory_space<any>>) target(%26 : memref<1x128xf32, #tpu.memory_space<vmem>>) target_semaphore(%28 : memref<!tpu.dma_semaphore, #tpu.memory_space<semaphore_mem>>)
      %c3 = arith.constant 3 : index
      %29 = memref.load %arg1[%c3] : memref<8xi32, #tpu.memory_space<smem>>
      %c3_i32 = arith.constant 3 : i32
      %c0_i32_20 = arith.constant 0 : i32
      %c0_i32_21 = arith.constant 0 : i32
      %30 = tpu.memref_slice %arg2[%29, %c0_i32_20, %c0_i32_21] : memref<32x1x128xf32, #tpu.memory_space<any>> -> memref<1x1x128xf32, #tpu.memory_space<any>>
      %31 = tpu.memref_squeeze %30 : memref<1x1x128xf32, #tpu.memory_space<any>> -> memref<1x128xf32, #tpu.memory_space<any>>
      %c3_i32_22 = arith.constant 3 : i32
      %c0_i32_23 = arith.constant 0 : i32
      %32 = tpu.memref_slice %arg13[%c3_i32_22, %c0_i32_23] : memref<8x128xf32, #tpu.memory_space<vmem>> -> memref<1x128xf32, #tpu.memory_space<vmem>>
      %33 = tpu.memref_slice %arg14[%c3_i32] : memref<8x!tpu.dma_semaphore, #tpu.memory_space<semaphore_mem>> -> memref<1x!tpu.dma_semaphore, #tpu.memory_space<semaphore_mem>>
      %34 = tpu.memref_squeeze %33 : memref<1x!tpu.dma_semaphore, #tpu.memory_space<semaphore_mem>> -> memref<!tpu.dma_semaphore, #tpu.memory_space<semaphore_mem>>
      tpu.enqueue_dma source(%31 : memref<1x128xf32, #tpu.memory_space<any>>) target(%32 : memref<1x128xf32, #tpu.memory_space<vmem>>) target_semaphore(%34 : memref<!tpu.dma_semaphore, #tpu.memory_space<semaphore_mem>>)
      %c4 = arith.constant 4 : index
      %35 = memref.load %arg1[%c4] : memref<8xi32, #tpu.memory_space<smem>>
      %c4_i32 = arith.constant 4 : i32
      %c0_i32_24 = arith.constant 0 : i32
      %c0_i32_25 = arith.constant 0 : i32
      %36 = tpu.memref_slice %arg2[%35, %c0_i32_24, %c0_i32_25] : memref<32x1x128xf32, #tpu.memory_space<any>> -> memref<1x1x128xf32, #tpu.memory_space<any>>
      %37 = tpu.memref_squeeze %36 : memref<1x1x128xf32, #tpu.memory_space<any>> -> memref<1x128xf32, #tpu.memory_space<any>>
      %c4_i32_26 = arith.constant 4 : i32
      %c0_i32_27 = arith.constant 0 : i32
      %38 = tpu.memref_slice %arg13[%c4_i32_26, %c0_i32_27] : memref<8x128xf32, #tpu.memory_space<vmem>> -> memref<1x128xf32, #tpu.memory_space<vmem>>
      %39 = tpu.memref_slice %arg14[%c4_i32] : memref<8x!tpu.dma_semaphore, #tpu.memory_space<semaphore_mem>> -> memref<1x!tpu.dma_semaphore, #tpu.memory_space<semaphore_mem>>
      %40 = tpu.memref_squeeze %39 : memref<1x!tpu.dma_semaphore, #tpu.memory_space<semaphore_mem>> -> memref<!tpu.dma_semaphore, #tpu.memory_space<semaphore_mem>>
      tpu.enqueue_dma source(%37 : memref<1x128xf32, #tpu.memory_space<any>>) target(%38 : memref<1x128xf32, #tpu.memory_space<vmem>>) target_semaphore(%40 : memref<!tpu.dma_semaphore, #tpu.memory_space<semaphore_mem>>)
      %c5 = arith.constant 5 : index
      %41 = memref.load %arg1[%c5] : memref<8xi32, #tpu.memory_space<smem>>
      %c5_i32 = arith.constant 5 : i32
      %c0_i32_28 = arith.constant 0 : i32
      %c0_i32_29 = arith.constant 0 : i32
      %42 = tpu.memref_slice %arg2[%41, %c0_i32_28, %c0_i32_29] : memref<32x1x128xf32, #tpu.memory_space<any>> -> memref<1x1x128xf32, #tpu.memory_space<any>>
      %43 = tpu.memref_squeeze %42 : memref<1x1x128xf32, #tpu.memory_space<any>> -> memref<1x128xf32, #tpu.memory_space<any>>
      %c5_i32_30 = arith.constant 5 : i32
      %c0_i32_31 = arith.constant 0 : i32
      %44 = tpu.memref_slice %arg13[%c5_i32_30, %c0_i32_31] : memref<8x128xf32, #tpu.memory_space<vmem>> -> memref<1x128xf32, #tpu.memory_space<vmem>>
      %45 = tpu.memref_slice %arg14[%c5_i32] : memref<8x!tpu.dma_semaphore, #tpu.memory_space<semaphore_mem>> -> memref<1x!tpu.dma_semaphore, #tpu.memory_space<semaphore_mem>>
      %46 = tpu.memref_squeeze %45 : memref<1x!tpu.dma_semaphore, #tpu.memory_space<semaphore_mem>> -> memref<!tpu.dma_semaphore, #tpu.memory_space<semaphore_mem>>
      tpu.enqueue_dma source(%43 : memref<1x128xf32, #tpu.memory_space<any>>) target(%44 : memref<1x128xf32, #tpu.memory_space<vmem>>) target_semaphore(%46 : memref<!tpu.dma_semaphore, #tpu.memory_space<semaphore_mem>>)
      %c6 = arith.constant 6 : index
      %47 = memref.load %arg1[%c6] : memref<8xi32, #tpu.memory_space<smem>>
      %c6_i32 = arith.constant 6 : i32
      %c0_i32_32 = arith.constant 0 : i32
      %c0_i32_33 = arith.constant 0 : i32
      %48 = tpu.memref_slice %arg2[%47, %c0_i32_32, %c0_i32_33] : memref<32x1x128xf32, #tpu.memory_space<any>> -> memref<1x1x128xf32, #tpu.memory_space<any>>
      %49 = tpu.memref_squeeze %48 : memref<1x1x128xf32, #tpu.memory_space<any>> -> memref<1x128xf32, #tpu.memory_space<any>>
      %c6_i32_34 = arith.constant 6 : i32
      %c0_i32_35 = arith.constant 0 : i32
      %50 = tpu.memref_slice %arg13[%c6_i32_34, %c0_i32_35] : memref<8x128xf32, #tpu.memory_space<vmem>> -> memref<1x128xf32, #tpu.memory_space<vmem>>
      %51 = tpu.memref_slice %arg14[%c6_i32] : memref<8x!tpu.dma_semaphore, #tpu.memory_space<semaphore_mem>> -> memref<1x!tpu.dma_semaphore, #tpu.memory_space<semaphore_mem>>
      %52 = tpu.memref_squeeze %51 : memref<1x!tpu.dma_semaphore, #tpu.memory_space<semaphore_mem>> -> memref<!tpu.dma_semaphore, #tpu.memory_space<semaphore_mem>>
      tpu.enqueue_dma source(%49 : memref<1x128xf32, #tpu.memory_space<any>>) target(%50 : memref<1x128xf32, #tpu.memory_space<vmem>>) target_semaphore(%52 : memref<!tpu.dma_semaphore, #tpu.memory_space<semaphore_mem>>)
      %c7 = arith.constant 7 : index
      %53 = memref.load %arg1[%c7] : memref<8xi32, #tpu.memory_space<smem>>
      %c7_i32 = arith.constant 7 : i32
      %c0_i32_36 = arith.constant 0 : i32
      %c0_i32_37 = arith.constant 0 : i32
      %54 = tpu.memref_slice %arg2[%53, %c0_i32_36, %c0_i32_37] : memref<32x1x128xf32, #tpu.memory_space<any>> -> memref<1x1x128xf32, #tpu.memory_space<any>>
      %55 = tpu.memref_squeeze %54 : memref<1x1x128xf32, #tpu.memory_space<any>> -> memref<1x128xf32, #tpu.memory_space<any>>
      %c7_i32_38 = arith.constant 7 : i32
      %c0_i32_39 = arith.constant 0 : i32
      %56 = tpu.memref_slice %arg13[%c7_i32_38, %c0_i32_39] : memref<8x128xf32, #tpu.memory_space<vmem>> -> memref<1x128xf32, #tpu.memory_space<vmem>>
      %57 = tpu.memref_slice %arg14[%c7_i32] : memref<8x!tpu.dma_semaphore, #tpu.memory_space<semaphore_mem>> -> memref<1x!tpu.dma_semaphore, #tpu.memory_space<semaphore_mem>>
      %58 = tpu.memref_squeeze %57 : memref<1x!tpu.dma_semaphore, #tpu.memory_space<semaphore_mem>> -> memref<!tpu.dma_semaphore, #tpu.memory_space<semaphore_mem>>
      tpu.enqueue_dma source(%55 : memref<1x128xf32, #tpu.memory_space<any>>) target(%56 : memref<1x128xf32, #tpu.memory_space<vmem>>) target_semaphore(%58 : memref<!tpu.dma_semaphore, #tpu.memory_space<semaphore_mem>>)
      %c0_40 = arith.constant 0 : index
      %59 = memref.load %arg1[%c0_40] : memref<8xi32, #tpu.memory_space<smem>>
      %c0_i32_41 = arith.constant 0 : i32
      %c0_i32_42 = arith.constant 0 : i32
      %c0_i32_43 = arith.constant 0 : i32
      %60 = tpu.memref_slice %arg2[%59, %c0_i32_42, %c0_i32_43] : memref<32x1x128xf32, #tpu.memory_space<any>> -> memref<1x1x128xf32, #tpu.memory_space<any>>
      %61 = tpu.memref_squeeze %60 : memref<1x1x128xf32, #tpu.memory_space<any>> -> memref<1x128xf32, #tpu.memory_space<any>>
      %c0_i32_44 = arith.constant 0 : i32
      %c0_i32_45 = arith.constant 0 : i32
      %62 = tpu.memref_slice %arg13[%c0_i32_44, %c0_i32_45] : memref<8x128xf32, #tpu.memory_space<vmem>> -> memref<1x128xf32, #tpu.memory_space<vmem>>
      %63 = tpu.memref_slice %arg14[%c0_i32_41] : memref<8x!tpu.dma_semaphore, #tpu.memory_space<semaphore_mem>> -> memref<1x!tpu.dma_semaphore, #tpu.memory_space<semaphore_mem>>
      %64 = tpu.memref_squeeze %63 : memref<1x!tpu.dma_semaphore, #tpu.memory_space<semaphore_mem>> -> memref<!tpu.dma_semaphore, #tpu.memory_space<semaphore_mem>>
      tpu.wait_dma2 semaphore(%64 : memref<!tpu.dma_semaphore, #tpu.memory_space<semaphore_mem>>) src(%61 : memref<1x128xf32, #tpu.memory_space<any>>) dst(%62 : memref<1x128xf32, #tpu.memory_space<vmem>>)
      %c1_46 = arith.constant 1 : index
      %65 = memref.load %arg1[%c1_46] : memref<8xi32, #tpu.memory_space<smem>>
      %c1_i32_47 = arith.constant 1 : i32
      %c0_i32_48 = arith.constant 0 : i32
      %c0_i32_49 = arith.constant 0 : i32
      %66 = tpu.memref_slice %arg2[%65, %c0_i32_48, %c0_i32_49] : memref<32x1x128xf32, #tpu.memory_space<any>> -> memref<1x1x128xf32, #tpu.memory_space<any>>
      %67 = tpu.memref_squeeze %66 : memref<1x1x128xf32, #tpu.memory_space<any>> -> memref<1x128xf32, #tpu.memory_space<any>>
      %c1_i32_50 = arith.constant 1 : i32
      %c0_i32_51 = arith.constant 0 : i32
      %68 = tpu.memref_slice %arg13[%c1_i32_50, %c0_i32_51] : memref<8x128xf32, #tpu.memory_space<vmem>> -> memref<1x128xf32, #tpu.memory_space<vmem>>
      %69 = tpu.memref_slice %arg14[%c1_i32_47] : memref<8x!tpu.dma_semaphore, #tpu.memory_space<semaphore_mem>> -> memref<1x!tpu.dma_semaphore, #tpu.memory_space<semaphore_mem>>
      %70 = tpu.memref_squeeze %69 : memref<1x!tpu.dma_semaphore, #tpu.memory_space<semaphore_mem>> -> memref<!tpu.dma_semaphore, #tpu.memory_space<semaphore_mem>>
      tpu.wait_dma2 semaphore(%70 : memref<!tpu.dma_semaphore, #tpu.memory_space<semaphore_mem>>) src(%67 : memref<1x128xf32, #tpu.memory_space<any>>) dst(%68 : memref<1x128xf32, #tpu.memory_space<vmem>>)
      %c2_52 = arith.constant 2 : index
      %71 = memref.load %arg1[%c2_52] : memref<8xi32, #tpu.memory_space<smem>>
      %c2_i32_53 = arith.constant 2 : i32
      %c0_i32_54 = arith.constant 0 : i32
      %c0_i32_55 = arith.constant 0 : i32
      %72 = tpu.memref_slice %arg2[%71, %c0_i32_54, %c0_i32_55] : memref<32x1x128xf32, #tpu.memory_space<any>> -> memref<1x1x128xf32, #tpu.memory_space<any>>
      %73 = tpu.memref_squeeze %72 : memref<1x1x128xf32, #tpu.memory_space<any>> -> memref<1x128xf32, #tpu.memory_space<any>>
      %c2_i32_56 = arith.constant 2 : i32
      %c0_i32_57 = arith.constant 0 : i32
      %74 = tpu.memref_slice %arg13[%c2_i32_56, %c0_i32_57] : memref<8x128xf32, #tpu.memory_space<vmem>> -> memref<1x128xf32, #tpu.memory_space<vmem>>
      %75 = tpu.memref_slice %arg14[%c2_i32_53] : memref<8x!tpu.dma_semaphore, #tpu.memory_space<semaphore_mem>> -> memref<1x!tpu.dma_semaphore, #tpu.memory_space<semaphore_mem>>
      %76 = tpu.memref_squeeze %75 : memref<1x!tpu.dma_semaphore, #tpu.memory_space<semaphore_mem>> -> memref<!tpu.dma_semaphore, #tpu.memory_space<semaphore_mem>>
      tpu.wait_dma2 semaphore(%76 : memref<!tpu.dma_semaphore, #tpu.memory_space<semaphore_mem>>) src(%73 : memref<1x128xf32, #tpu.memory_space<any>>) dst(%74 : memref<1x128xf32, #tpu.memory_space<vmem>>)
      %c3_58 = arith.constant 3 : index
      %77 = memref.load %arg1[%c3_58] : memref<8xi32, #tpu.memory_space<smem>>
      %c3_i32_59 = arith.constant 3 : i32
      %c0_i32_60 = arith.constant 0 : i32
      %c0_i32_61 = arith.constant 0 : i32
      %78 = tpu.memref_slice %arg2[%77, %c0_i32_60, %c0_i32_61] : memref<32x1x128xf32, #tpu.memory_space<any>> -> memref<1x1x128xf32, #tpu.memory_space<any>>
      %79 = tpu.memref_squeeze %78 : memref<1x1x128xf32, #tpu.memory_space<any>> -> memref<1x128xf32, #tpu.memory_space<any>>
      %c3_i32_62 = arith.constant 3 : i32
      %c0_i32_63 = arith.constant 0 : i32
      %80 = tpu.memref_slice %arg13[%c3_i32_62, %c0_i32_63] : memref<8x128xf32, #tpu.memory_space<vmem>> -> memref<1x128xf32, #tpu.memory_space<vmem>>
      %81 = tpu.memref_slice %arg14[%c3_i32_59] : memref<8x!tpu.dma_semaphore, #tpu.memory_space<semaphore_mem>> -> memref<1x!tpu.dma_semaphore, #tpu.memory_space<semaphore_mem>>
      %82 = tpu.memref_squeeze %81 : memref<1x!tpu.dma_semaphore, #tpu.memory_space<semaphore_mem>> -> memref<!tpu.dma_semaphore, #tpu.memory_space<semaphore_mem>>
      tpu.wait_dma2 semaphore(%82 : memref<!tpu.dma_semaphore, #tpu.memory_space<semaphore_mem>>) src(%79 : memref<1x128xf32, #tpu.memory_space<any>>) dst(%80 : memref<1x128xf32, #tpu.memory_space<vmem>>)
      %c4_64 = arith.constant 4 : index
      %83 = memref.load %arg1[%c4_64] : memref<8xi32, #tpu.memory_space<smem>>
      %c4_i32_65 = arith.constant 4 : i32
      %c0_i32_66 = arith.constant 0 : i32
      %c0_i32_67 = arith.constant 0 : i32
      %84 = tpu.memref_slice %arg2[%83, %c0_i32_66, %c0_i32_67] : memref<32x1x128xf32, #tpu.memory_space<any>> -> memref<1x1x128xf32, #tpu.memory_space<any>>
      %85 = tpu.memref_squeeze %84 : memref<1x1x128xf32, #tpu.memory_space<any>> -> memref<1x128xf32, #tpu.memory_space<any>>
      %c4_i32_68 = arith.constant 4 : i32
      %c0_i32_69 = arith.constant 0 : i32
      %86 = tpu.memref_slice %arg13[%c4_i32_68, %c0_i32_69] : memref<8x128xf32, #tpu.memory_space<vmem>> -> memref<1x128xf32, #tpu.memory_space<vmem>>
      %87 = tpu.memref_slice %arg14[%c4_i32_65] : memref<8x!tpu.dma_semaphore, #tpu.memory_space<semaphore_mem>> -> memref<1x!tpu.dma_semaphore, #tpu.memory_space<semaphore_mem>>
      %88 = tpu.memref_squeeze %87 : memref<1x!tpu.dma_semaphore, #tpu.memory_space<semaphore_mem>> -> memref<!tpu.dma_semaphore, #tpu.memory_space<semaphore_mem>>
      tpu.wait_dma2 semaphore(%88 : memref<!tpu.dma_semaphore, #tpu.memory_space<semaphore_mem>>) src(%85 : memref<1x128xf32, #tpu.memory_space<any>>) dst(%86 : memref<1x128xf32, #tpu.memory_space<vmem>>)
      %c5_70 = arith.constant 5 : index
      %89 = memref.load %arg1[%c5_70] : memref<8xi32, #tpu.memory_space<smem>>
      %c5_i32_71 = arith.constant 5 : i32
      %c0_i32_72 = arith.constant 0 : i32
      %c0_i32_73 = arith.constant 0 : i32
      %90 = tpu.memref_slice %arg2[%89, %c0_i32_72, %c0_i32_73] : memref<32x1x128xf32, #tpu.memory_space<any>> -> memref<1x1x128xf32, #tpu.memory_space<any>>
      %91 = tpu.memref_squeeze %90 : memref<1x1x128xf32, #tpu.memory_space<any>> -> memref<1x128xf32, #tpu.memory_space<any>>
      %c5_i32_74 = arith.constant 5 : i32
      %c0_i32_75 = arith.constant 0 : i32
      %92 = tpu.memref_slice %arg13[%c5_i32_74, %c0_i32_75] : memref<8x128xf32, #tpu.memory_space<vmem>> -> memref<1x128xf32, #tpu.memory_space<vmem>>
      %93 = tpu.memref_slice %arg14[%c5_i32_71] : memref<8x!tpu.dma_semaphore, #tpu.memory_space<semaphore_mem>> -> memref<1x!tpu.dma_semaphore, #tpu.memory_space<semaphore_mem>>
      %94 = tpu.memref_squeeze %93 : memref<1x!tpu.dma_semaphore, #tpu.memory_space<semaphore_mem>> -> memref<!tpu.dma_semaphore, #tpu.memory_space<semaphore_mem>>
      tpu.wait_dma2 semaphore(%94 : memref<!tpu.dma_semaphore, #tpu.memory_space<semaphore_mem>>) src(%91 : memref<1x128xf32, #tpu.memory_space<any>>) dst(%92 : memref<1x128xf32, #tpu.memory_space<vmem>>)
      %c6_76 = arith.constant 6 : index
      %95 = memref.load %arg1[%c6_76] : memref<8xi32, #tpu.memory_space<smem>>
      %c6_i32_77 = arith.constant 6 : i32
      %c0_i32_78 = arith.constant 0 : i32
      %c0_i32_79 = arith.constant 0 : i32
      %96 = tpu.memref_slice %arg2[%95, %c0_i32_78, %c0_i32_79] : memref<32x1x128xf32, #tpu.memory_space<any>> -> memref<1x1x128xf32, #tpu.memory_space<any>>
      %97 = tpu.memref_squeeze %96 : memref<1x1x128xf32, #tpu.memory_space<any>> -> memref<1x128xf32, #tpu.memory_space<any>>
      %c6_i32_80 = arith.constant 6 : i32
      %c0_i32_81 = arith.constant 0 : i32
      %98 = tpu.memref_slice %arg13[%c6_i32_80, %c0_i32_81] : memref<8x128xf32, #tpu.memory_space<vmem>> -> memref<1x128xf32, #tpu.memory_space<vmem>>
      %99 = tpu.memref_slice %arg14[%c6_i32_77] : memref<8x!tpu.dma_semaphore, #tpu.memory_space<semaphore_mem>> -> memref<1x!tpu.dma_semaphore, #tpu.memory_space<semaphore_mem>>
      %100 = tpu.memref_squeeze %99 : memref<1x!tpu.dma_semaphore, #tpu.memory_space<semaphore_mem>> -> memref<!tpu.dma_semaphore, #tpu.memory_space<semaphore_mem>>
      tpu.wait_dma2 semaphore(%100 : memref<!tpu.dma_semaphore, #tpu.memory_space<semaphore_mem>>) src(%97 : memref<1x128xf32, #tpu.memory_space<any>>) dst(%98 : memref<1x128xf32, #tpu.memory_space<vmem>>)
      %c7_82 = arith.constant 7 : index
      %101 = memref.load %arg1[%c7_82] : memref<8xi32, #tpu.memory_space<smem>>
      %c7_i32_83 = arith.constant 7 : i32
      %c0_i32_84 = arith.constant 0 : i32
      %c0_i32_85 = arith.constant 0 : i32
      %102 = tpu.memref_slice %arg2[%101, %c0_i32_84, %c0_i32_85] : memref<32x1x128xf32, #tpu.memory_space<any>> -> memref<1x1x128xf32, #tpu.memory_space<any>>
      %103 = tpu.memref_squeeze %102 : memref<1x1x128xf32, #tpu.memory_space<any>> -> memref<1x128xf32, #tpu.memory_space<any>>
      %c7_i32_86 = arith.constant 7 : i32
      %c0_i32_87 = arith.constant 0 : i32
      %104 = tpu.memref_slice %arg13[%c7_i32_86, %c0_i32_87] : memref<8x128xf32, #tpu.memory_space<vmem>> -> memref<1x128xf32, #tpu.memory_space<vmem>>
      %105 = tpu.memref_slice %arg14[%c7_i32_83] : memref<8x!tpu.dma_semaphore, #tpu.memory_space<semaphore_mem>> -> memref<1x!tpu.dma_semaphore, #tpu.memory_space<semaphore_mem>>
      %106 = tpu.memref_squeeze %105 : memref<1x!tpu.dma_semaphore, #tpu.memory_space<semaphore_mem>> -> memref<!tpu.dma_semaphore, #tpu.memory_space<semaphore_mem>>
      tpu.wait_dma2 semaphore(%106 : memref<!tpu.dma_semaphore, #tpu.memory_space<semaphore_mem>>) src(%103 : memref<1x128xf32, #tpu.memory_space<any>>) dst(%104 : memref<1x128xf32, #tpu.memory_space<vmem>>)
      %c0_88 = arith.constant 0 : index
      %c0_89 = arith.constant 0 : index
      %107 = vector.load %arg13[%c0_88, %c0_89] : memref<8x128xf32, #tpu.memory_space<vmem>>, vector<8x128xf32>
      %108 = arith.truncf %107 : vector<8x128xf32> to vector<8x128xbf16>
      %c0_90 = arith.constant 0 : index
      %c0_91 = arith.constant 0 : index
      %109 = vector.load %arg12[%c0_90, %c0_91] : memref<8x256xbf16, #tpu.memory_space<vmem>>, vector<8x128xbf16>
      tpu.vector_store %arg12[%c0_90, %c0_91], %108 {strides = array<i32>} : memref<8x256xbf16, #tpu.memory_space<vmem>>, vector<8x128xbf16>,
    } else {
    }
    %c2_i32 = arith.constant 2 : i32
    %3 = arith.cmpi slt, %arg0, %c2_i32 : i32
    %4 = arith.extui %3 : i1 to i32
    %c0_i32_1 = arith.constant 0 : i32
    %5 = arith.cmpi ne, %4, %c0_i32_1 : i32
    scf.if %5 {
      %c0 = arith.constant 0 : index
      %c0_4 = arith.constant 0 : index
      %c0_5 = arith.constant 0 : index
      %9 = vector.load %arg3[%c0, %c0_4, %c0_5] : memref<1x8x128xf32, #tpu.memory_space<vmem>>, vector<1x8x128xf32>
      %10 = vector.shape_cast %9 : vector<1x8x128xf32> to vector<8x128xf32>
      %11 = arith.truncf %10 : vector<8x128xf32> to vector<8x128xbf16>
      %c0_6 = arith.constant 0 : index
      %c128 = arith.constant 128 : index
      %12 = vector.load %arg12[%c0_6, %c128] : memref<8x256xbf16, #tpu.memory_space<vmem>>, vector<8x128xbf16>
      tpu.vector_store %arg12[%c0_6, %c128], %11 {strides = array<i32>} : memref<8x256xbf16, #tpu.memory_space<vmem>>, vector<8x128xbf16>,
      %c0_7 = arith.constant 0 : index
      %c0_8 = arith.constant 0 : index
      %13 = vector.load %arg12[%c0_7, %c0_8] : memref<8x256xbf16, #tpu.memory_space<vmem>>, vector<8x256xbf16>
      %c0_9 = arith.constant 0 : index
      %c0_10 = arith.constant 0 : index
      %c0_11 = arith.constant 0 : index
      %14 = vector.load %arg5[%c0_9, %c0_10, %c0_11] : memref<1x256x512xbf16, #tpu.memory_space<vmem>>, vector<1x256x512xbf16>
      %15 = vector.shape_cast %14 : vector<1x256x512xbf16> to vector<256x512xbf16>
      %cst = arith.constant dense<0.000000e+00> : vector<8x512xf32>
      %16 = tpu.matmul %13, %15, %cst {dimension_numbers = #tpu.dot_dimension_numbers<[1], [0], [0], [1], [0, 0, 1, 1], [], []>} : vector<8x256xbf16>, vector<256x512xbf16>, vector<8x512xf32> -> vector<8x512xf32>
      %c0_12 = arith.constant 0 : index
      %c0_13 = arith.constant 0 : index
      %c0_14 = arith.constant 0 : index
      %17 = vector.load %arg6[%c0_12, %c0_13, %c0_14] : memref<1x1x512xf32, #tpu.memory_space<vmem>>, vector<1x1x512xf32>
      %18 = vector.shape_cast %17 : vector<1x1x512xf32> to vector<1x512xf32>
      %19 = vector.broadcast %18 : vector<1x512xf32> to vector<8x512xf32>
      %20 = arith.addf %16, %19 : vector<8x512xf32>
      %21 = vector.extract_strided_slice %20 {offsets = [0, 0], sizes = [8, 128], strides = [1, 1]} : vector<8x512xf32> to vector<8x128xf32>
      %22 = arith.negf %21 : vector<8x128xf32>
      %23 = math.exp %22 : vector<8x128xf32>
      %cst_15 = arith.constant 1.000000e+00 : f32
      %24 = vector.broadcast %cst_15 : f32 to vector<8x128xf32>
      %25 = arith.addf %24, %23 : vector<8x128xf32>
      %26 = arith.divf %24, %25 : vector<8x128xf32>
      %27 = vector.extract_strided_slice %20 {offsets = [0, 128], sizes = [8, 128], strides = [1, 1]} : vector<8x512xf32> to vector<8x128xf32>
      %28 = arith.negf %27 : vector<8x128xf32>
      %29 = math.exp %28 : vector<8x128xf32>
      %cst_16 = arith.constant 1.000000e+00 : f32
      %30 = vector.broadcast %cst_16 : f32 to vector<8x128xf32>
      %31 = arith.addf %30, %29 : vector<8x128xf32>
      %32 = arith.divf %30, %31 : vector<8x128xf32>
      %33 = vector.extract_strided_slice %20 {offsets = [0, 256], sizes = [8, 128], strides = [1, 1]} : vector<8x512xf32> to vector<8x128xf32>
      %34 = math.tanh %33 : vector<8x128xf32>
      %35 = vector.extract_strided_slice %20 {offsets = [0, 384], sizes = [8, 128], strides = [1, 1]} : vector<8x512xf32> to vector<8x128xf32>
      %36 = arith.negf %35 : vector<8x128xf32>
      %37 = math.exp %36 : vector<8x128xf32>
      %cst_17 = arith.constant 1.000000e+00 : f32
      %38 = vector.broadcast %cst_17 : f32 to vector<8x128xf32>
      %39 = arith.addf %38, %37 : vector<8x128xf32>
      %40 = arith.divf %38, %39 : vector<8x128xf32>
      %c0_18 = arith.constant 0 : index
      %c0_19 = arith.constant 0 : index
      %c0_20 = arith.constant 0 : index
      %41 = vector.load %arg4[%c0_18, %c0_19, %c0_20] : memref<1x8x128xf32, #tpu.memory_space<vmem>>, vector<1x8x128xf32>
      %42 = vector.shape_cast %41 : vector<1x8x128xf32> to vector<8x128xf32>
      %43 = arith.mulf %32, %42 : vector<8x128xf32>
      %44 = arith.mulf %26, %34 : vector<8x128xf32>
      %45 = arith.addf %43, %44 : vector<8x128xf32>
      %46 = math.tanh %45 : vector<8x128xf32>
      %47 = arith.mulf %40, %46 : vector<8x128xf32>
      %c0_21 = arith.constant 0 : index
      %c0_22 = arith.constant 0 : index
      %c0_23 = arith.constant 0 : index
      %48 = vector.load %arg10[%c0_21, %c0_22, %c0_23] : memref<1x8x128xf32, #tpu.memory_space<vmem>>, vector<1x8x128xf32>
      %49 = vector.shape_cast %48 : vector<1x8x128xf32> to vector<8x128xf32>
      %50 = vector.shape_cast %47 : vector<8x128xf32> to vector<1x8x128xf32>
      tpu.vector_store %arg10[%c0_21, %c0_22, %c0_23], %50 {strides = array<i32>} : memref<1x8x128xf32, #tpu.memory_space<vmem>>, vector<1x8x128xf32>,
      %c0_24 = arith.constant 0 : index
      %c0_25 = arith.constant 0 : index
      %c0_26 = arith.constant 0 : index
      %51 = vector.load %arg11[%c0_24, %c0_25, %c0_26] : memref<1x8x128xf32, #tpu.memory_space<vmem>>, vector<1x8x128xf32>
      %52 = vector.shape_cast %51 : vector<1x8x128xf32> to vector<8x128xf32>
      %53 = vector.shape_cast %45 : vector<8x128xf32> to vector<1x8x128xf32>
      tpu.vector_store %arg11[%c0_24, %c0_25, %c0_26], %53 {strides = array<i32>} : memref<1x8x128xf32, #tpu.memory_space<vmem>>, vector<1x8x128xf32>,
      %54 = arith.truncf %47 : vector<8x128xf32> to vector<8x128xbf16>
      %c0_27 = arith.constant 0 : index
      %c0_28 = arith.constant 0 : index
      %55 = vector.load %arg12[%c0_27, %c0_28] : memref<8x256xbf16, #tpu.memory_space<vmem>>, vector<8x128xbf16>
      tpu.vector_store %arg12[%c0_27, %c0_28], %54 {strides = array<i32>} : memref<8x256xbf16, #tpu.memory_space<vmem>>, vector<8x128xbf16>,
    } else {
    }
    %c2_i32_2 = arith.constant 2 : i32
    %6 = arith.cmpi sge, %arg0, %c2_i32_2 : i32
    %7 = arith.extui %6 : i1 to i32
    %c0_i32_3 = arith.constant 0 : i32
    %8 = arith.cmpi ne, %7, %c0_i32_3 : i32
    scf.if %8 {
      %c0 = arith.constant 0 : index
      %c0_4 = arith.constant 0 : index
      %9 = vector.load %arg12[%c0, %c0_4] : memref<8x256xbf16, #tpu.memory_space<vmem>>, vector<8x128xbf16>
      %c0_5 = arith.constant 0 : index
      %c0_6 = arith.constant 0 : index
      %10 = vector.load %arg7[%c0_5, %c0_6] : memref<128x128xbf16, #tpu.memory_space<vmem>>, vector<128x128xbf16>
      %cst = arith.constant dense<0.000000e+00> : vector<8x128xf32>
      %11 = tpu.matmul %9, %10, %cst {dimension_numbers = #tpu.dot_dimension_numbers<[1], [0], [0], [1], [0, 0, 1, 1], [], []>} : vector<8x128xbf16>, vector<128x128xbf16>, vector<8x128xf32> -> vector<8x128xf32>
      %c0_7 = arith.constant 0 : index
      %c0_8 = arith.constant 0 : index
      %12 = vector.load %arg8[%c0_7, %c0_8] : memref<1x128xf32, #tpu.memory_space<vmem>>, vector<1x128xf32>
      %13 = vector.broadcast %12 : vector<1x128xf32> to vector<8x128xf32>
      %14 = arith.addf %11, %13 : vector<8x128xf32>
      %c0_9 = arith.constant 0 : index
      %c0_10 = arith.constant 0 : index
      %15 = vector.load %arg9[%c0_9, %c0_10] : memref<8x128xf32, #tpu.memory_space<vmem>>, vector<8x128xf32>
      tpu.vector_store %arg9[%c0_9, %c0_10], %14 {strides = array<i32>} : memref<8x128xf32, #tpu.memory_space<vmem>>, vector<8x128xf32>,
    } else {
    }
    return
  }
  func.func @transform_1(%arg0: i32, %arg1: memref<8xi32, #tpu.memory_space<smem>>) -> (i32, i32, i32) {
    %c1_i32 = arith.constant 1 : i32
    %0 = arith.minsi %arg0, %c1_i32 : i32
    %c0_i32 = arith.constant 0 : i32
    %c0_i32_0 = arith.constant 0 : i32
    %c0_i32_1 = arith.constant 0 : i32
    return %0, %c0_i32, %c0_i32_0 : i32, i32, i32
  }
  func.func @transform_2(%arg0: i32, %arg1: memref<8xi32, #tpu.memory_space<smem>>) -> (i32, i32, i32) {
    %c1_i32 = arith.constant 1 : i32
    %0 = arith.minsi %arg0, %c1_i32 : i32
    %c0_i32 = arith.constant 0 : i32
    %c0_i32_0 = arith.constant 0 : i32
    %c0_i32_1 = arith.constant 0 : i32
    return %0, %c0_i32, %c0_i32_0 : i32, i32, i32
  }
  func.func @transform_3(%arg0: i32, %arg1: memref<8xi32, #tpu.memory_space<smem>>) -> (i32, i32, i32) {
    %c1_i32 = arith.constant 1 : i32
    %0 = arith.minsi %arg0, %c1_i32 : i32
    %c0_i32 = arith.constant 0 : i32
    %c0_i32_0 = arith.constant 0 : i32
    %c0_i32_1 = arith.constant 0 : i32
    return %0, %c0_i32, %c0_i32_0 : i32, i32, i32
  }
  func.func @transform_4(%arg0: i32, %arg1: memref<8xi32, #tpu.memory_space<smem>>) -> (i32, i32, i32) {
    %c1_i32 = arith.constant 1 : i32
    %0 = arith.minsi %arg0, %c1_i32 : i32
    %c0_i32 = arith.constant 0 : i32
    %c0_i32_0 = arith.constant 0 : i32
    %c0_i32_1 = arith.constant 0 : i32
    return %0, %c0_i32, %c0_i32_0 : i32, i32, i32
  }
  func.func @transform_5(%arg0: i32, %arg1: memref<8xi32, #tpu.memory_space<smem>>) -> (i32, i32) {
    %c2_i32 = arith.constant 2 : i32
    %0 = arith.subi %arg0, %c2_i32 : i32
    %c0_i32 = arith.constant 0 : i32
    %1 = arith.maxsi %0, %c0_i32 : i32
    %c0_i32_0 = arith.constant 0 : i32
    %c0_i32_1 = arith.constant 0 : i32
    return %c0_i32_0, %1 : i32, i32
  }
  func.func @transform_6(%arg0: i32, %arg1: memref<8xi32, #tpu.memory_space<smem>>) -> (i32, i32) {
    %c2_i32 = arith.constant 2 : i32
    %0 = arith.subi %arg0, %c2_i32 : i32
    %c0_i32 = arith.constant 0 : i32
    %1 = arith.maxsi %0, %c0_i32 : i32
    %c0_i32_0 = arith.constant 0 : i32
    %c0_i32_1 = arith.constant 0 : i32
    return %c0_i32_0, %1 : i32, i32
  }
  func.func @transform_7(%arg0: i32, %arg1: memref<8xi32, #tpu.memory_space<smem>>) -> (i32, i32) {
    %c2_i32 = arith.constant 2 : i32
    %0 = arith.subi %arg0, %c2_i32 : i32
    %c0_i32 = arith.constant 0 : i32
    %1 = arith.maxsi %0, %c0_i32 : i32
    %c0_i32_0 = arith.constant 0 : i32
    %c0_i32_1 = arith.constant 0 : i32
    return %c0_i32_0, %1 : i32, i32
  }
  func.func @transform_8(%arg0: i32, %arg1: memref<8xi32, #tpu.memory_space<smem>>) -> (i32, i32, i32) {
    %c1_i32 = arith.constant 1 : i32
    %0 = arith.minsi %arg0, %c1_i32 : i32
    %c0_i32 = arith.constant 0 : i32
    %c0_i32_0 = arith.constant 0 : i32
    %c0_i32_1 = arith.constant 0 : i32
    return %0, %c0_i32, %c0_i32_0 : i32, i32, i32
  }
  func.func @transform_9(%arg0: i32, %arg1: memref<8xi32, #tpu.memory_space<smem>>) -> (i32, i32, i32) {
    %c1_i32 = arith.constant 1 : i32
    %0 = arith.minsi %arg0, %c1_i32 : i32
    %c0_i32 = arith.constant 0 : i32
    %c0_i32_0 = arith.constant 0 : i32
    %c0_i32_1 = arith.constant 0 : i32
    return %0, %c0_i32, %c0_i32_0 : i32, i32, i32
  }
}

</mosaic_0001>

<bundles_post_ra>
// kernel: tpu_custom_call.1
= control target key start
LH: loop header
LB: loop body
LE: loop exit
PB: predicated region body
PF: predicated region fallthrough
CT: control target
= control target key end

     0   :  { %s2888_s16 = smov [#allocation6]   ;;  %s3608_s0 = inlined_call_operand.hbm [shape: s32[8], index: 0, kind: input, shape index: {}]   ;;  %s3609_s1 = inlined_call_operand.hbm [shape: f32[32,1,128], index: 1, kind: input, shape index: {}]   ;;  %s3610_s2 = inlined_call_operand.hbm [shape: f32[2,8,128], index: 2, kind: input, shape index: {}]   ;;  %s3611_s3 = inlined_call_operand.hbm [shape: f32[2,8,128], index: 3, kind: input, shape index: {}]   ;;  %s3612_s4 = inlined_call_operand.hbm [shape: bf16[2,256,512], index: 4, kind: input, shape index: {}]   ;;  %s3613_s5 = inlined_call_operand.hbm [shape: f32[2,1,512], index: 5, kind: input, shape index: {}]   ;;  %s3614_s6 = inlined_call_operand.hbm [shape: bf16[128,128], index: 6, kind: input, shape index: {}]   ;;  %s3615_s7 = inlined_call_operand.vmem [shape: f32[1,128], index: 7, kind: input, shape index: {}]   ;;  %s3616_s8 = inlined_call_operand.hbm [shape: f32[8,128], index: 8, kind: output, shape index: {0}]   ;;  %s3617_s9 = inlined_call_operand.hbm [shape: f32[2,8,128], index: 9, kind: output, shape index: {1}]   ;;  %s3618_s10 = inlined_call_operand.hbm [shape: f32[2,8,128], index: 10, kind: output, shape index: {2}]  }
   0x1   :  { %3650 = sst [smem:[#allocation69_spill]] %s3609_s1  ;;  %s17_s15 = sshll.u32 %s3608_s0, 4  ;;  %s18_s15 = int_to_ptr.hbm [resolvable:$true] %s17_s15 }
   0x2   :  { %3651 = sst [smem:[#allocation70_spill]] %s3610_s2 }
   0x3   :  { %3652 = sst [smem:[#allocation71_spill]] %s3611_s3 }
   0x4   :  { %3653 = sst [smem:[#allocation72_spill]] %s3612_s4 }
   0x5   :  { %3654 = sst [smem:[#allocation73_spill]] %s3613_s5 }
   0x6   :  { %3655 = sst [smem:[#allocation74_spill]] %s3614_s6 }
   0x7   :  { %3656 = sst [smem:[#allocation75_spill]] %s3615_s7 }
   0x8   :  { %3657 = sst [smem:[#allocation76_spill]] %s3616_s8 }
   0x9   :  { %3658 = sst [smem:[#allocation77_spill]] %s3617_s9 }
   0xa   :  { %3659 = sst [smem:[#allocation78_spill]] %s3618_s10 }
   0xb   :  { %20 = dma.hbm_to_smem %s18_s15, 16, %s2888_s16, [#allocation5] }
   0xc   :  { %2818 = dma.done.wait [#allocation5], 16 }
   0xd   :  { %2819 = vsyncadd [#allocation5], 4294967280 }
   0xe   :  { %23 = sfence }
   0xf   :  { %24 = vsyncpa [#allocation8], 0 }
  0x10   :  { %26 = vsyncpa [#allocation8 + $0x1], 0 }
  0x11   :  { %27 = vsyncpa [#allocation11], 0 }
  0x12   :  { %29 = vsyncpa [#allocation11 + $0x1], 0 }
  0x13   :  { %30 = vsyncpa [#allocation14], 0 }
  0x14   :  { %32 = vsyncpa [#allocation14 + $0x1], 0 }
  0x15   :  { %33 = vsyncpa [#allocation9], 0 }
  0x16   :  { %35 = vsyncpa [#allocation9 + $0x1], 0 }
  0x17   :  { %36 = vsyncpa [#allocation18], 0 }
  0x18   :  { %38 = vsyncpa [#allocation18 + $0x1], 0  ;;  %s2960_s17 = smov 0   ;;  %s2962_s18 = smov 0  }
  0x19   :  { %s2964_s0 = smov 0   ;;  %s2966_s19 = smov 0  }
  0x1a   :  { %s2968_s20 = smov 0   ;;  %s2970_s21 = smov 0  }
  0x1b   :  { %s2972_s22 = smov 0  }
  0x1c LB: > { %3660 = sst [smem:[#allocation53_spill]] %s2866_s18  ;;  %s2996_s23 = sadd.s32 4294967295, %s2886_s22   ;;  %s2886_s22 = sphi %s2972_s22, %s3727_s22   ;;  %s2882_s21 = sphi %s2970_s21, %s3733_s21   ;;  %s2878_s20 = sphi %s2968_s20, %s3732_s20   ;;  %s2874_s19 = sphi %s2966_s19, %s3731_s19   ;;  %s2870_s0 = sphi %s2964_s0, %s3730_s0   ;;  %s2866_s18 = sphi %s2962_s18, %s3729_s18   ;;  %s2862_s17 = sphi %s2960_s17, %s3728_s17  }
  0x1d   : > { %3661 = sst [smem:[#allocation54_spill]] %s2870_s0  ;;  %s2999_s24 = sadd.s32 1, %s2886_s22  }
  0x1e   : > { %3662 = sst [smem:[#allocation55_spill]] %s2878_s20  ;;  %p48_p0 = scmp.lt.s32.totalorder %s2886_s22, 1 }
  0x1f   : > { %3663 = sst [smem:[#allocation56_spill]] %s2882_s21  ;;  %p50_p1 = scmp.lt.s32.totalorder %s2999_s24, 1 }
  0x20   : > { %3664 = sst [smem:[#allocation57_spill]] %s2996_s23  ;;  %s55_s25 = sadd.s32 1, %s2882_s21 }
  0x21   : > { %3665 = sst [smem:[#allocation58_spill]] %s2999_s24  ;;  %p62_p2 = scmp.ne.s32.totalorder %s2882_s21, %s2878_s20 }
  0x22   : > { %s3007_s26 = scalar_select %p48_p0, %s2886_s22, 1 }
  0x23   : > { %s51_s27 = scalar_select %p50_p1, %s2999_s24, 1 }
  0x24   : > { %p63_p3 = scmp.eq.s32.totalorder %s2886_s22, 0  ;;  %p3630_p4 = scmp.ne.s32.totalorder %s2878_s20, %s2874_s19 }
  0x25   : > { %s52_s28 = ssub.s32 %s3007_s26, %s51_s27  ;;  %p69_p5 = scmp.eq.s32.totalorder %s2996_s23, 0 }
  0x26   : > { %p53_p6 = scmp.eq.s32.totalorder %s52_s28, 0  ;;  %p3018_p7 = por %p63_p3, %p62_p2 }
  0x27   : > { %p3025_p8 = por %p69_p5, %p3630_p4  ;;  %p184_p9 = scmp.ne.s32.totalorder %s2870_s0, %s2866_s18 }
  0x28   : > { %s3032_s11 = scalar_select %p53_p6, %s2882_s21, %s55_s25  }
  0x29   : > { %s3667_s30 = scalar_select %p3025_p8, 1, 0 }
  0x2a   : > { %3669 = sst [smem:[#allocation60_spill]] %s3032_s11  ;;  %p3034_p10 = por %p184_p9, %p63_p3 }
  0x2b   : > { %3668 = sst [smem:[#allocation59_spill]] %s3667_s30  ;;  %p3631_p11 = scmp.ne.s32.totalorder %s2866_s18, %s2862_s17 }
  0x2c   : > { %p252_p12 = scmp.eq.s32.totalorder %s2996_s23, 2  ;;  %p2263_p0 = scmp.lt.s32.totalorder %s2886_s22, 3 }
  0x2d   : > { %p3044_p13 = por %p3631_p11, %p69_p5  ;;  %s3061_s16 = sand.u32 1, %s2882_s21  }
  0x2e   : > { %p3049_p1 = por %p252_p12, %p184_p9  ;;  %p3056_p3 = por %p252_p12, %p62_p2 }
  0x2f   : > { %s3671_s13 = scalar_select %p3044_p13, 1, 0 }
  0x30   : > { %s3673_s14 = scalar_select %p3049_p1, 1, 0 }
  0x31   : > { %3672 = sst [smem:[#allocation61_spill]] %s3671_s13  ;;  %s3634_s25 = sshll.u32 %s3007_s26, 3 }
  0x32   : > { %3674 = sst [smem:[#allocation62_spill]] %s3673_s14  ;;  %s3633_s27 = sshll.u32 %s3061_s16, 3 }
  0x33   : > { %s3675_s15 = scalar_select %p3056_p3, 1, 0 }
  0x34   : > { %p3069_p5 = pnand %p2263_p0, %p3018_p7  ;;  %s359_s11 = sand.u32 1, %s2886_s22  }
  0x35   : > { %3676 = sst [smem:[#allocation63_spill]] %s3675_s15  ;;  %s363_s21 = scalar_lea.vmem [#allocation10], %s3633_s27 }
  0x36   : > { %s3678_s3 = sld [smem:[#allocation71_spill]]  ;;  %s373_s9 = sshll.u32 %s363_s21, 4  ;;  %s374_s9 = int_to_ptr.vmem [resolvable:$true] %s373_s9 }
  0x37   : > { %p3085_p2 = pnand %p2263_p0, %p3034_p10  ;;  %s3091_s7 = scalar_lea.sflag [#allocation11], %s359_s11 }
  0x38   : > { %p3632_p7 = pneg %p3069_p5 }
  0x3c   : > { %s369_s10 = scalar_lea.hbm %s3678_s3, %s3634_s25  ;;  %s2371_s21 = scalar_lea.hbm %s3678_s3, 16 }
  0x3d   : > { %s371_s15 = sshll.u32 %s369_s10, 4  ;;  %s372_s15 = int_to_ptr.hbm [resolvable:$true] %s371_s15 }
  0x3e   : > { %s2364_s1 = sshra.s32 %s372_s15, 4  ;;  %s2365_s1 = int_to_ptr.hbm [resolvable:$true] %s2364_s1 }
  0x3f   : > { %s2366_s13 = scalar_lea.hbm %s2365_s1, 8  ;;  %p2372_p10 = scmp.lt.s32.totalorder %s2365_s1, %s3678_s3 }
  0x40   : > { %p2367_p6 = scmp.ne.s32.totalorder %s2365_s1, %s2366_s13  ;;  %p2373_p0 = scmp.lt.s32.totalorder %s2371_s21, %s2366_s13 }
  0x42   : > { %p2369_p9 = pnand %p3632_p7, %p2367_p6  ;;  %p2374_p4 = por %p2373_p0, %p2372_p10 }
  0x44   : > { %p2370_p12 = pneg %p2369_p9 }
  0x46   : > { %p2375_p11 = pnand %p2374_p4, %p2370_p12 }
  0x48   : > { %2378 = shalt.err (!%p2375_p11)
}
  0x49   : > { %2243 = dma.hbm_to_vmem [thread:$0]  (!%p3069_p5), %s372_s15, 128, %s374_s9, %s3091_s7  }
  0x4a   : > { %p1815_p6 = scmp.ge.s32.totalorder %s2886_s22, 1  ;;  %p459_p9 = scmp.lt.s32.totalorder %s2886_s22, 4 }
  0x4b   : > { %s1810_s8 = sshll.u32 %s3061_s16, 2  ;;  %s1811_s10 = sshll.u32 %s3007_s26, 2 }
  0x4c   : > { %p3111_p7 = pnand %p1815_p6, %p459_p9  ;;  %s3682_s5 = sld [smem:[#allocation73_spill]] }
  0x4d   : > { %s408_s14 = scalar_lea.vmem [#allocation13], %s1810_s8  ;;  %s3120_s9 = scalar_lea.sflag [#allocation14], %s359_s11 }
  0x4e   : > { %s3680_s1 = scalar_select %p3111_p7, 1, 0 }
  0x4f   : > { %s418_s27 = sshll.u32 %s408_s14, 4  ;;  %p3683_p11 = pneg %p3069_p5  ;;  %s419_s27 = int_to_ptr.vmem [resolvable:$true] %s418_s27 }
  0x50   : > { %3681 = sst [smem:[#allocation64_spill]] %s3680_s1 }
  0x52   : > { %s414_s12 = scalar_lea.hbm %s3682_s5, %s1811_s10  ;;  %s2401_s10 = scalar_lea.hbm %s3682_s5, 8 }
  0x53   : > { %s416_s25 = sshll.u32 %s414_s12, 4  ;;  %s417_s25 = int_to_ptr.hbm [resolvable:$true] %s416_s25 }
  0x54   : > { %s2394_s15 = sshra.s32 %s417_s25, 4  ;;  %s2395_s15 = int_to_ptr.hbm [resolvable:$true] %s2394_s15 }
  0x55   : > { %s2396_s3 = scalar_lea.hbm %s2395_s15, 4  ;;  %p2402_p0 = scmp.lt.s32.totalorder %s2395_s15, %s3682_s5 }
  0x56   : > { %p2397_p4 = scmp.ne.s32.totalorder %s2395_s15, %s2396_s3  ;;  %p2403_p6 = scmp.lt.s32.totalorder %s2401_s10, %s2396_s3 }
  0x58   : > { %p2399_p12 = pnand %p2397_p4, %p3683_p11  ;;  %p2404_p9 = por %p2403_p6, %p2402_p0 }
  0x5a   : > { %p2400_p10 = pneg %p2399_p12 }
  0x5c   : > { %p2405_p1 = pnand %p2404_p9, %p2400_p10 }
  0x5e   : > { %2408 = shalt.err (!%p2405_p1)
}
  0x5f   : > { %2249 = dma.hbm_to_vmem [thread:$0]  (!%p3069_p5), %s417_s25, 64, %s419_s27, %s3120_s9  }
  0x60   : > { %s3684_s11 = sshll.u32 %s3007_s26, 3  ;;  %s3685_s2 = sld [smem:[#allocation70_spill]] }
  0x61   : > { %s3686_s14 = sshll.u32 %s3061_s16, 3  ;;  %s339_s10 = scalar_lea.sflag [#allocation8], %s3061_s16 }
  0x62   : > { %s342_s15 = scalar_lea.vmem [#allocation7], %s3686_s14  ;;  %p3687_p4 = pmov %p3683_p11 }
  0x63   : > { %s352_s3 = sshll.u32 %s342_s15, 4  ;;  %s353_s3 = int_to_ptr.vmem [resolvable:$true] %s352_s3 }
  0x66   : > { %s348_s30 = scalar_lea.hbm %s3685_s2, %s3684_s11  ;;  %s2431_s21 = scalar_lea.hbm %s3685_s2, 16 }
  0x67   : > { %s350_s12 = sshll.u32 %s348_s30, 4  ;;  %s351_s12 = int_to_ptr.hbm [resolvable:$true] %s350_s12 }
  0x68   : > { %s2424_s8 = sshra.s32 %s351_s12, 4  ;;  %s2425_s8 = int_to_ptr.hbm [resolvable:$true] %s2424_s8 }
  0x69   : > { %s2426_s13 = scalar_lea.hbm %s2425_s8, 8  ;;  %p2432_p10 = scmp.lt.s32.totalorder %s2425_s8, %s3685_s2 }
  0x6a   : > { %p2427_p1 = scmp.ne.s32.totalorder %s2425_s8, %s2426_s13  ;;  %p2433_p0 = scmp.lt.s32.totalorder %s2431_s21, %s2426_s13 }
  0x6c   : > { %p2429_p11 = pnand %p2427_p1, %p3687_p4  ;;  %p2434_p6 = por %p2433_p0, %p2432_p10 }
  0x6e   : > { %p2430_p12 = pneg %p2429_p11 }
  0x70   : > { %p2435_p9 = pnand %p2434_p6, %p2430_p12 }
  0x72   : > { %2438 = shalt.err (!%p2435_p9)
}
  0x73   : > { %2240 = dma.hbm_to_vmem [thread:$0]  (!%p3069_p5), %s351_s12, 128, %s353_s3, %s339_s10  }
  0x74   : > { %s1807_s30 = sshll.u32 %s3061_s16, 9  ;;  %s2148_s14 = sshll.u32 %s3007_s26, 9 }
  0x75   : > { %s3688_s4 = sld [smem:[#allocation72_spill]]  ;;  %s384_s1 = scalar_lea.vmem [#allocation12], %s1807_s30 }
  0x76   : > { %s394_s11 = sshll.u32 %s384_s1, 4  ;;  %s395_s11 = int_to_ptr.vmem [resolvable:$true] %s394_s11 }
  0x7b   : > { %s391_s25 = scalar_lea.hbm %s3688_s4, %s2148_s14  ;;  %s2461_s26 = scalar_lea.hbm %s3688_s4, 1024 }
  0x7c   : > { %s392_s27 = sshll.u32 %s391_s25, 4  ;;  %s393_s27 = int_to_ptr.hbm [resolvable:$true] %s392_s27 }
  0x7d   : > { %s2454_s8 = sshra.s32 %s393_s27, 4  ;;  %s2455_s8 = int_to_ptr.hbm [resolvable:$true] %s2454_s8 }
  0x7e   : > { %s2456_s13 = scalar_lea.hbm %s2455_s8, 512  ;;  %p2462_p10 = scmp.lt.s32.totalorder %s2455_s8, %s3688_s4 }
  0x7f   : > { %p2457_p1 = scmp.ne.s32.totalorder %s2455_s8, %s2456_s13  ;;  %p2463_p0 = scmp.lt.s32.totalorder %s2461_s26, %s2456_s13 }
  0x81   : > { %p2459_p11 = pnand %p2457_p1, %p3687_p4  ;;  %p2464_p6 = por %p2463_p0, %p2462_p10 }
  0x83   : > { %p2460_p12 = pneg %p2459_p11 }
  0x85   : > { %p2465_p9 = pnand %p2464_p6, %p2460_p12 }
  0x87   : > { %2468 = shalt.err (!%p2465_p9)
}
  0x88   : > { %s2889_s1 = smov 256   ;;  %s2890_s10 = smov 16  }
  0x89   : > { %2246 = dma.hbm_to_vmem [thread:$0]  (!%p3069_p5), %s393_s27, 8192, %s395_s11, %s3091_s7, %s2889_s1, %s2889_s1, %s2890_s10  }
  0x8a   : > { %s3171_s21 = sadd.s32 4294967294, %s2886_s22   ;;  %s1796_s23 = sadd.s32 4294967294, %s2999_s24 }
  0x8b   : > { %3689 = sst [smem:[#allocation65_spill]] %s3171_s21  ;;  %p169_p1 = scmp.gt.s32.totalorder %s3171_s21, 0 }
  0x8c   : > { %p172_p4 = scmp.gt.s32.totalorder %s1796_s23, 0  ;;  %s177_s30 = sadd.s32 1, %s2870_s0 }
  0x8d   : > { %p258_p11 = scmp.eq.s32.totalorder %s3171_s21, 2  ;;  %p3690_p12 = scmp.ne.s32.totalorder %s2866_s18, %s2862_s17 }
  0x8e   : > { %s170_s14 = scalar_select %p169_p1, %s3171_s21, 0 }
  0x8f   : > { %s3735_s23 = smov (!%p172_p4, %s1796_s23), 0  ;;  %p3181_p10 = por %p258_p11, %p3690_p12 }
  0x90   : > { %p3692_p0 = scmp.ne.s32.totalorder %s2878_s20, %s2874_s19  ;;  %s174_s28 = ssub.s32 %s170_s14, %s3735_s23 }
  0x91   : > { %s427_s25 = sand.u32 1, %s2870_s0   ;;  %p175_p6 = scmp.eq.s32.totalorder %s174_s28, 0 }
  0x92   : > { %p3188_p5 = por %p258_p11, %p3692_p0  ;;  %s1812_s27 = sshll.u32 %s427_s25, 6 }
  0x93   : > { %s1814_s11 = sshll.u32 %s170_s14, 2  ;;  %s3696_s6 = sld [smem:[#allocation74_spill]] }
  0x94   : > { %s3693_s7 = scalar_select %p3188_p5, 1, 0 }
  0x95   : > { %s3194_s8 = scalar_select %p175_p6, %s2870_s0, %s177_s30  }
  0x96   : > { %3694 = sst [smem:[#allocation66_spill]] %s3693_s7  ;;  %s429_s26 = scalar_lea.vmem [#allocation15], %s1812_s27 }
  0x97   : > { %3695 = sst [smem:[#allocation67_spill]] %s3194_s8  ;;  %s439_s3 = sshll.u32 %s429_s26, 4  ;;  %s440_s3 = int_to_ptr.vmem [resolvable:$true] %s439_s3 }
  0x98   : > { %p2488_p1 = pneg %p3085_p2 }
  0x99   : > { %s436_s16 = scalar_lea.hbm %s3696_s6, %s1814_s11  ;;  %s2491_s30 = scalar_lea.hbm %s3696_s6, 64 }
  0x9a   : > { %s437_s5 = sshll.u32 %s436_s16, 4  ;;  %s438_s5 = int_to_ptr.hbm [resolvable:$true] %s437_s5 }
  0x9b   : > { %s2484_s19 = sshra.s32 %s438_s5, 4  ;;  %s2485_s19 = int_to_ptr.hbm [resolvable:$true] %s2484_s19 }
  0x9c   : > { %s2486_s1 = scalar_lea.hbm %s2485_s19, 64  ;;  %p2492_p12 = scmp.lt.s32.totalorder %s2485_s19, %s3696_s6 }
  0x9d   : > { %p2487_p9 = scmp.ne.s32.totalorder %s2485_s19, %s2486_s1  ;;  %p2493_p0 = scmp.lt.s32.totalorder %s2491_s30, %s2486_s1 }
  0x9f   : > { %p2489_p4 = pnand %p2488_p1, %p2487_p9  ;;  %p2494_p6 = por %p2493_p0, %p2492_p12 }
  0xa1   : > { %p2490_p11 = pneg %p2489_p4 }
  0xa3   : > { %p2495_p5 = pnand %p2494_p6, %p2490_p11 }
  0xa5   : > { %2498 = shalt.err (!%p2495_p5)
}
  0xa6   : > { %s2891_s25 = smov 64   ;;  %s2892_s27 = smov 4  }
  0xa7   : > { %2252 = dma.hbm_to_vmem [thread:$0]  (!%p3085_p2), %s438_s5, 1024, %s440_s3, %s3120_s9, %s2891_s25, %s2891_s25, %s2892_s27  }
  0xa8   : > { %463 = sbr.rel (%p3111_p7) target bundleno = 810 (0x32a), region = 44  ;;  %s465_s12 = sand.u32 (!%p3111_p7), 1, %s2878_s20  }
  0xa9   : > { %s3213_s16 = sshll.u32 (!%p3111_p7), %s465_s12, 3  ;;  %s466_s26 = scalar_lea.sflag (!%p3111_p7), [#allocation8], %s465_s12 }
  0xad   : > { %2821 = dma.done.wait (%p3025_p8), %s466_s26, 128  }
  0xae   : > { %2823 = vsyncadd (%p3025_p8), %s466_s26, 4294967168  ;;  %s3699_s1 = sld [smem:[#allocation57_spill]] }
  0xb4   : > { %s3221_s29 = sand.u32 1, %s3699_s1  }
  0xb5   : > { %s476_s9 = scalar_lea.sflag [#allocation11], %s3221_s29 }
  0xb6   : > { %2825 = dma.done.wait (%p3025_p8), %s476_s9, 8320  }
  0xb7   : > { %2827 = vsyncadd (%p3025_p8), %s476_s9, 4294958976  ;;  %s1818_s5 = sshll.u32 %s465_s12, 9  ;;  %s1819_s10 = sshll.u32 %s465_s12, 2 }
  0xb8   : > { %s3229_s23 = scalar_lea.vmem [#allocation12], %s1818_s5  ;;  %s496_s30 = scalar_lea.sflag [#allocation14], %s3221_s29 }
  0xb9   : > { %s3232_s14 = scalar_lea.vmem [#allocation13], %s1819_s10 }
  0xba   : > { %2829 = dma.done.wait (%p3025_p8), %s496_s30, 64  }
  0xbb   : > { %2831 = vsyncadd (%p3025_p8), %s496_s30, 4294967232  ;;  %s3239_s25 = sand.u32 1, %s2866_s18  }
  0xbc   : > { %s1820_s27 = sshll.u32 %s3239_s25, 6 }
  0xbd   : > { %s3242_s11 = scalar_lea.vmem [#allocation15], %s1820_s27 }
  0xbe   : > { %2833 = dma.done.wait (%p3044_p13), %s496_s30, 1024  }
  0xbf   : > { %2835 = vsyncadd (%p3044_p13), %s496_s30, 4294966272  ;;  %s1821_s12 = sshll.u32 %s3239_s25, 3  ;;  %p1830_p8 = scmp.ne.s32.totalorder %s3699_s1, 0 }
  0xc0   : > { %s3249_s26 = scalar_lea.vmem [#allocation16], %s1821_s12 }
  0xc1   : > { %610 = sbr.rel (%p1830_p8) target bundleno = 322 (0x142), region = 68 }
  0xc6   : > { %s612_s5 = sld [smem:[#allocation6]]  ;;  %s2893_s10 = smov [#allocation3]   ;;  %v2894_v0 = vmov 0  }
  0xc7   : > { %s3254_s27 = sshll.u32 %s2893_s10, 4  ;;  %s1831_s3 = sld [smem:[#allocation6 + $0x1]]  ;;  %611 = vst [vmem:[#allocation2] sm:$0xff] %v2894_v0  ;;  %s624_s27 = int_to_ptr.vmem [resolvable:$true] %s3254_s27 }
  0xc8   : > { %s2895_s30 = smov [#allocation3 + $0x1]   ;;  %s3259_s12 = sld [smem:[#allocation6 + $0x2]] }
  0xc9   : > { %s3257_s28 = sshll.u32 %s2895_s30, 4  ;;  %s2896_s13 = smov [#allocation3 + $0x2]  }
  0xca   : > { %3701 = sst [smem:[#allocation68_spill]] %s3257_s28  ;;  %s3262_s9 = sshll.u32 %s2896_s13, 4  ;;  %s658_s9 = int_to_ptr.vmem [resolvable:$true] %s3262_s9 }
  0xcb   : > { %s3264_s1 = sld [smem:[#allocation6 + $0x3]] }
  0xcc   : > { %s3702_s2 = sld [smem:[#allocation69_spill]] }
  0xd2   : > { %s613_s4 = scalar_lea.hbm %s3702_s2, %s612_s5  ;;  %s628_s30 = scalar_lea.hbm %s3702_s2, %s1831_s3 }
  0xd3   : > { %s621_s6 = sshll.u32 %s613_s4, 4  ;;  %s638_s0 = sshll.u32 %s628_s30, 4  ;;  %s622_s6 = int_to_ptr.hbm [resolvable:$true] %s621_s6  ;;  %s639_s0 = int_to_ptr.hbm [resolvable:$true] %s638_s0 }
  0xd4   : > { %s2514_s18 = sshra.s32 %s622_s6, 4  ;;  %s3276_s7 = scalar_lea.hbm %s3702_s2, 32  ;;  %s2515_s18 = int_to_ptr.hbm [resolvable:$true] %s2514_s18 }
  0xd5   : > { %s2516_s28 = scalar_lea.hbm %s2515_s18, 1  ;;  %p2519_p2 = scmp.lt.s32.totalorder %s2515_s18, %s3702_s2 }
  0xd6   : > { %p2517_p13 = scmp.ne.s32.totalorder %s2515_s18, %s2516_s28  ;;  %p2520_p7 = scmp.lt.s32.totalorder %s3276_s7, %s2516_s28 }
  0xd8   : > { %p2521_p5 = por %p2520_p7, %p2519_p2 }
  0xda   : > { %p2522_p9 = pnand %p2521_p5, %p2517_p13 }
  0xdc   : > { %2525 = shalt.err (!%p2522_p9)  }
  0xdd   : > { %626 = dma.hbm_to_vmem [thread:$0]  %s622_s6, 16, %s624_s27, [#allocation4] }
  0xde   : > { %s645_s8 = scalar_lea.hbm %s3702_s2, %s3259_s12  ;;  %s2538_s24 = sshra.s32 %s639_s0, 4  ;;  %s2539_s24 = int_to_ptr.hbm [resolvable:$true] %s2538_s24 }
  0xdf   : > { %s2540_s3 = scalar_lea.hbm %s2539_s24, 1  ;;  %p2543_p4 = scmp.lt.s32.totalorder %s2539_s24, %s3702_s2 }
  0xe0   : > { %p2541_p1 = scmp.ne.s32.totalorder %s2539_s24, %s2540_s3  ;;  %p2544_p11 = scmp.lt.s32.totalorder %s3276_s7, %s2540_s3 }
  0xe2   : > { %p2545_p12 = por %p2544_p11, %p2543_p4 }
  0xe4   : > { %p2546_p0 = pnand %p2545_p12, %p2541_p1 }
  0xe6   : > { %2549 = shalt.err (!%p2546_p0)  }
  0xe7   : > { %s3703_s6 = sld [smem:[#allocation68_spill]]  ;;  %s655_s27 = sshll.u32 %s645_s8, 4  ;;  %s656_s27 = int_to_ptr.hbm [resolvable:$true] %s655_s27 }
  0xe8   : > { %s662_s10 = scalar_lea.hbm %s3702_s2, %s3264_s1  ;;  %s2562_s13 = sshra.s32 %s656_s27, 4  ;;  %s2563_s13 = int_to_ptr.hbm [resolvable:$true] %s2562_s13 }
  0xe9   : > { %s672_s30 = sshll.u32 %s662_s10, 4  ;;  %s2564_s19 = scalar_lea.hbm %s2563_s13, 1  ;;  %s673_s30 = int_to_ptr.hbm [resolvable:$true] %s672_s30 }
  0xea   : > { %p2565_p6 = scmp.ne.s32.totalorder %s2563_s13, %s2564_s19  ;;  %p2567_p8 = scmp.lt.s32.totalorder %s2563_s13, %s3702_s2 }
  0xeb   : > { %p2568_p13 = scmp.lt.s32.totalorder %s3276_s7, %s2564_s19 }
  0xed   : > { %s3704_s18 = int_to_ptr.vmem [resolvable:$true] %s3703_s6  ;;  %p2569_p2 = por %p2568_p13, %p2567_p8 }
  0xee   : > { %643 = dma.hbm_to_vmem [thread:$0]  %s639_s0, 16, %s3704_s18, [#allocation4 + $0x1] }
  0xef   : > { %p2570_p7 = pnand %p2569_p2, %p2565_p6 }
  0xf1   : > { %2573 = shalt.err (!%p2570_p7)  }
  0xf2   : > { %660 = dma.hbm_to_vmem [thread:$0]  %s656_s27, 16, %s658_s9, [#allocation4 + $0x2] }
  0xf3   : > { %s2897_s0 = smov [#allocation3 + $0x3]   ;;  %s1834_s8 = sld [smem:[#allocation6 + $0x4]] }
  0xf4   : > { %s674_s1 = sshll.u32 %s2897_s0, 4  ;;  %s2586_s24 = sshra.s32 %s673_s30, 4  ;;  %s675_s1 = int_to_ptr.vmem [resolvable:$true] %s674_s1  ;;  %s2587_s24 = int_to_ptr.hbm [resolvable:$true] %s2586_s24 }
  0xf5   : > { %s2588_s3 = scalar_lea.hbm %s2587_s24, 1  ;;  %p2591_p9 = scmp.lt.s32.totalorder %s2587_s24, %s3702_s2 }
  0xf6   : > { %p2589_p5 = scmp.ne.s32.totalorder %s2587_s24, %s2588_s3  ;;  %p2592_p1 = scmp.lt.s32.totalorder %s3276_s7, %s2588_s3 }
  0xf8   : > { %p2593_p4 = por %p2592_p1, %p2591_p9 }
  0xfa   : > { %p2594_p11 = pnand %p2593_p4, %p2589_p5 }
  0xfc   : > { %2597 = shalt.err (!%p2594_p11)  }
  0xfd   : > { %677 = dma.hbm_to_vmem [thread:$0]  %s673_s30, 16, %s675_s1, [#allocation4 + $0x3] }
  0xfe   : > { %s2898_s6 = smov [#allocation3 + $0x4]   ;;  %s1835_s18 = sld [smem:[#allocation6 + $0x5]] }
  0xff   : > { %s691_s9 = sshll.u32 %s2898_s6, 4  ;;  %s2899_s27 = smov [#allocation3 + $0x5]   ;;  %s692_s9 = int_to_ptr.vmem [resolvable:$true] %s691_s9 }
 0x100   : > { %s3306_s28 = sshll.u32 %s2899_s27, 4  ;;  %s1836_s12 = sld [smem:[#allocation6 + $0x6]]  ;;  %s709_s28 = int_to_ptr.vmem [resolvable:$true] %s3306_s28 }
 0x101   : > { %s679_s19 = scalar_lea.hbm %s3702_s2, %s1834_s8  ;;  %s2900_s20 = smov [#allocation3 + $0x6]  }
 0x102   : > { %s689_s4 = sshll.u32 %s679_s19, 4  ;;  %s3312_s0 = sshll.u32 %s2900_s20, 4  ;;  %s690_s4 = int_to_ptr.hbm [resolvable:$true] %s689_s4  ;;  %s726_s0 = int_to_ptr.vmem [resolvable:$true] %s3312_s0 }
 0x103   : > { %s2610_s30 = sshra.s32 %s690_s4, 4  ;;  %s2611_s30 = int_to_ptr.hbm [resolvable:$true] %s2610_s30 }
 0x104   : > { %s2612_s1 = scalar_lea.hbm %s2611_s30, 1  ;;  %p2615_p0 = scmp.lt.s32.totalorder %s2611_s30, %s3702_s2 }
 0x105   : > { %p2613_p12 = scmp.ne.s32.totalorder %s2611_s30, %s2612_s1  ;;  %p2616_p6 = scmp.lt.s32.totalorder %s3276_s7, %s2612_s1 }
 0x107   : > { %p2617_p8 = por %p2616_p6, %p2615_p0 }
 0x109   : > { %p2618_p13 = pnand %p2617_p8, %p2613_p12 }
 0x10b   : > { %2621 = shalt.err (!%p2618_p13)  }
 0x10c   : > { %694 = dma.hbm_to_vmem [thread:$0]  %s690_s4, 16, %s692_s9, [#allocation4 + $0x4] }
 0x10d   : > { %s696_s21 = scalar_lea.hbm %s3702_s2, %s1835_s18  ;;  %s713_s13 = scalar_lea.hbm %s3702_s2, %s1836_s12 }
 0x10e   : > { %s706_s6 = sshll.u32 %s696_s21, 4  ;;  %s723_s19 = sshll.u32 %s713_s13, 4  ;;  %s707_s6 = int_to_ptr.hbm [resolvable:$true] %s706_s6  ;;  %s724_s19 = int_to_ptr.hbm [resolvable:$true] %s723_s19 }
 0x10f   : > { %s2634_s20 = sshra.s32 %s707_s6, 4  ;;  %s2635_s20 = int_to_ptr.hbm [resolvable:$true] %s2634_s20 }
 0x110   : > { %s2636_s30 = scalar_lea.hbm %s2635_s20, 1  ;;  %p2639_p7 = scmp.lt.s32.totalorder %s2635_s20, %s3702_s2 }
 0x111   : > { %p2637_p2 = scmp.ne.s32.totalorder %s2635_s20, %s2636_s30  ;;  %p2640_p5 = scmp.lt.s32.totalorder %s3276_s7, %s2636_s30 }
 0x113   : > { %p2641_p9 = por %p2640_p5, %p2639_p7 }
 0x115   : > { %p2642_p1 = pnand %p2641_p9, %p2637_p2 }
 0x117   : > { %2645 = shalt.err (!%p2642_p1)  }
 0x118   : > { %711 = dma.hbm_to_vmem [thread:$0]  %s707_s6, 16, %s709_s28, [#allocation4 + $0x5] }
 0x119   : > { %s1837_s18 = sld [smem:[#allocation6 + $0x7]]  ;;  %s2658_s12 = sshra.s32 %s724_s19, 4  ;;  %s2659_s12 = int_to_ptr.hbm [resolvable:$true] %s2658_s12 }
 0x11a   : > { %s2660_s4 = scalar_lea.hbm %s2659_s12, 1  ;;  %p2663_p11 = scmp.lt.s32.totalorder %s2659_s12, %s3702_s2 }
 0x11b   : > { %p2661_p4 = scmp.ne.s32.totalorder %s2659_s12, %s2660_s4  ;;  %p2664_p12 = scmp.lt.s32.totalorder %s3276_s7, %s2660_s4 }
 0x11d   : > { %p2665_p0 = por %p2664_p12, %p2663_p11 }
 0x11f   : > { %p2666_p6 = pnand %p2665_p0, %p2661_p4 }
 0x121   : > { %2669 = shalt.err (!%p2666_p6)  }
 0x122   : > { %728 = dma.hbm_to_vmem [thread:$0]  %s724_s19, 16, %s726_s0, [#allocation4 + $0x6] }
 0x123   : > { %s2901_s8 = smov [#allocation3 + $0x7]   ;;  %s730_s6 = scalar_lea.hbm %s3702_s2, %s1837_s18 }
 0x124   : > { %s742_s5 = sshll.u32 %s2901_s8, 4  ;;  %s740_s27 = sshll.u32 %s730_s6, 4  ;;  %s743_s5 = int_to_ptr.vmem [resolvable:$true] %s742_s5  ;;  %s741_s27 = int_to_ptr.hbm [resolvable:$true] %s740_s27 }
 0x125   : > { %s2682_s10 = sshra.s32 %s741_s27, 4  ;;  %s2683_s10 = int_to_ptr.hbm [resolvable:$true] %s2682_s10 }
 0x126   : > { %s2684_s13 = scalar_lea.hbm %s2683_s10, 1  ;;  %p2687_p13 = scmp.lt.s32.totalorder %s2683_s10, %s3702_s2 }
 0x127   : > { %p2685_p8 = scmp.ne.s32.totalorder %s2683_s10, %s2684_s13  ;;  %p2688_p2 = scmp.lt.s32.totalorder %s3276_s7, %s2684_s13 }
 0x129   : > { %p2689_p7 = por %p2688_p2, %p2687_p13 }
 0x12b   : > { %p2690_p5 = pnand %p2689_p7, %p2685_p8 }
 0x12d   : > { %2693 = shalt.err (!%p2690_p5)  }
 0x12e   : > { %745 = dma.hbm_to_vmem [thread:$0]  %s741_s27, 16, %s743_s5, [#allocation4 + $0x7] }
 0x12f   : > { %2836 = dma.done.wait [#allocation4], 16 }
 0x130   : > { %2837 = vsyncadd [#allocation4], 4294967280 }
 0x131   : > { %2838 = dma.done.wait [#allocation4 + $0x1], 16 }
 0x132   : > { %2839 = vsyncadd [#allocation4 + $0x1], 4294967280 }
 0x133   : > { %2840 = dma.done.wait [#allocation4 + $0x2], 16 }
 0x134   : > { %2841 = vsyncadd [#allocation4 + $0x2], 4294967280 }
 0x135   : > { %2842 = dma.done.wait [#allocation4 + $0x3], 16 }
 0x136   : > { %2843 = vsyncadd [#allocation4 + $0x3], 4294967280 }
 0x137   : > { %2844 = dma.done.wait [#allocation4 + $0x4], 16 }
 0x138   : > { %2845 = vsyncadd [#allocation4 + $0x4], 4294967280 }
 0x139   : > { %2846 = dma.done.wait [#allocation4 + $0x5], 16 }
 0x13a   : > { %2847 = vsyncadd [#allocation4 + $0x5], 4294967280 }
 0x13b   : > { %2848 = dma.done.wait [#allocation4 + $0x6], 16 }
 0x13c   : > { %2849 = vsyncadd [#allocation4 + $0x6], 4294967280 }
 0x13d   : > { %2850 = dma.done.wait [#allocation4 + $0x7], 16 }
 0x13e   : > { %2851 = vsyncadd [#allocation4 + $0x7], 4294967280  ;;  %v771_v1 = vld [vmem:[#allocation3] sm:$0xff] }
 0x13f   : > { %v772_v2 = vpack.c.bf16 %v771_v1, %v771_v1 }
 0x141   : > { %773 = vst [vmem:[#allocation2] sm:$0xf] %v772_v2 }
 0x142 PF: > { %s3705_s7 = sld [smem:[#allocation57_spill]] }
 0x148   : > { %p1838_p9 = scmp.ge.s32.totalorder %s3705_s7, 2 }
 0x149   : > { %s3706_s0 = scalar_lea.vmem (!%p1838_p9), [#allocation7], %s3213_s16  ;;  %s3711_s19 = scalar_lea.vmem (!%p1838_p9), [#allocation17], %s3213_s16 }
 0x14a   : > { %777 = sbr.rel (%p1838_p9) target bundleno = 571 (0x23b), region = 104 }
 0x14f   : > { %v1953_v3 = vld [vmem:[%s3229_s23 + $0xe0] sm:$0xf]  ;;  %v2179_v4 = vld [vmem:[%s3229_s23 + $0xec] sm:$0xf0]  ;;  %v2177_v5 = vld [vmem:[%s3229_s23 + $0xe4] sm:$0xf] }
 0x150   : > { %v1954_v6 = vor.u32 %v2179_v4, %v1953_v3  ;;  %v1955_v7 = vld [vmem:[%s3229_s23 + $0xf0] sm:$0xf0]  ;;  %v2209_v8 = vld [vmem:[%s3229_s23 + $0x1e4] sm:$0xf]  ;;  %v2081_v12 = vld [vmem:[%s3229_s23 + $0x1e0] sm:$0xf] }
 0x151   : > { %v2083_v9 = vld [vmem:[%s3229_s23 + $0x1f0] sm:$0xf0]  ;;  %v1958_v10 = vor.u32 %v2177_v5, %v1955_v7  ;;  %v2211_v13 = vld [vmem:[%s3229_s23 + $0x1ec] sm:$0xf0]  ;;  %v1937_v14 = vld [vmem:[%s3229_s23 + $0xc0] sm:$0xf] }
 0x152   : > { %v2086_v11 = vor.u32 %v2209_v8, %v2083_v9  ;;  %1183 = vmatpush.bf16.msra.mxu0 %v1954_v6  ;;  %v2082_v15 = vor.u32 %v2211_v13, %v2081_v12  ;;  %v2175_v16 = vld [vmem:[%s3229_s23 + $0xcc] sm:$0xf0]  ;;  %v2173_v17 = vld [vmem:[%s3229_s23 + $0xc4] sm:$0xf]  ;;  %v1939_v18 = vld [vmem:[%s3229_s23 + $0xd0] sm:$0xf0] }
 0x153   : > { %1209 = vmatpush.bf16.msra.mxu2 %v1958_v10  ;;  %v1938_v19 = vor.u32 %v2175_v16, %v1937_v14  ;;  %v1942_v20 = vor.u32 %v2173_v17, %v1939_v18  ;;  %v2205_v21 = vld [vmem:[%s3229_s23 + $0x1c4] sm:$0xf]  ;;  %v2067_v22 = vld [vmem:[%s3229_s23 + $0x1d0] sm:$0xf0]  ;;  %v2065_v23 = vld [vmem:[%s3229_s23 + $0x1c0] sm:$0xf] }
 0x154   : > { %1222 = vmatpush.bf16.msra.mxu3 %v2086_v11  ;;  %1196 = vmatpush.bf16.msra.mxu1 %v2082_v15  ;;  %v2070_v24 = vor.u32 %v2205_v21, %v2067_v22  ;;  %v2207_v25 = vld [vmem:[%s3229_s23 + $0x1cc] sm:$0xf0]  ;;  %v1921_v26 = vld [vmem:[%s3229_s23 + $0xa0] sm:$0xf]  ;;  %v2169_v29 = vld [vmem:[%s3229_s23 + $0xa4] sm:$0xf] }
 0x155   : > { %v2171_v27 = vld [vmem:[%s3229_s23 + $0xac] sm:$0xf0]  ;;  %v2066_v28 = vor.u32 %v2207_v25, %v2065_v23  ;;  %v1923_v30 = vld [vmem:[%s3229_s23 + $0xb0] sm:$0xf0]  ;;  %v2201_v31 = vld [vmem:[%s3229_s23 + $0x1a4] sm:$0xf] }
 0x156   : > { %1184 = vmatpush.bf16.msra.mxu0 %v1938_v19  ;;  %v1922_v32 = vor.u32 %v2171_v27, %v1921_v26  ;;  %v2051_v33 = vld [vmem:[%s3229_s23 + $0x1b0] sm:$0xf0]  ;;  %v2049_v34 = vld [vmem:[%s3229_s23 + $0x1a0] sm:$0xf]  ;;  %v2203_v35 = vld [vmem:[%s3229_s23 + $0x1ac] sm:$0xf0]  ;;  %v1926_v36 = vor.u32 %v2169_v29, %v1923_v30 }
 0x157   : > { %1210 = vmatpush.bf16.msra.mxu2 %v1942_v20  ;;  %v2054_v37 = vor.u32 %v2201_v31, %v2051_v33  ;;  %v1905_v38 = vld [vmem:[%s3229_s23 + $0x80] sm:$0xf]  ;;  %v2167_v39 = vld [vmem:[%s3229_s23 + $0x8c] sm:$0xf0]  ;;  %v2165_v40 = vld [vmem:[%s3229_s23 + $0x84] sm:$0xf]  ;;  %v2050_v41 = vor.u32 %v2203_v35, %v2049_v34 }
 0x158   : > { %1223 = vmatpush.bf16.msra.mxu3 %v2070_v24  ;;  %1197 = vmatpush.bf16.msra.mxu1 %v2066_v28  ;;  %v1907_v42 = vld [vmem:[%s3229_s23 + $0x90] sm:$0xf0]  ;;  %v2197_v43 = vld [vmem:[%s3229_s23 + $0x184] sm:$0xf]  ;;  %v2033_v45 = vld [vmem:[%s3229_s23 + $0x180] sm:$0xf]  ;;  %v1906_v47 = vor.u32 %v2167_v39, %v1905_v38 }
 0x159   : > { %v2035_v44 = vld [vmem:[%s3229_s23 + $0x190] sm:$0xf0]  ;;  %v2199_v46 = vld [vmem:[%s3229_s23 + $0x18c] sm:$0xf0]  ;;  %v1910_v48 = vor.u32 %v2165_v40, %v1907_v42  ;;  %v1889_v50 = vld [vmem:[%s3229_s23 + $0x60] sm:$0xf] }
 0x15a   : > { %1185 = vmatpush.bf16.msra.mxu0 %v1922_v32  ;;  %v2038_v49 = vor.u32 %v2197_v43, %v2035_v44  ;;  %v2163_v51 = vld [vmem:[%s3229_s23 + $0x6c] sm:$0xf0]  ;;  %v2161_v52 = vld [vmem:[%s3229_s23 + $0x64] sm:$0xf]  ;;  %v2034_v53 = vor.u32 %v2199_v46, %v2033_v45  ;;  %v1891_v54 = vld [vmem:[%s3229_s23 + $0x70] sm:$0xf0] }
 0x15b   : > { %1211 = vmatpush.bf16.msra.mxu2 %v1926_v36  ;;  %v2193_v55 = vld [vmem:[%s3229_s23 + $0x164] sm:$0xf]  ;;  %v2019_v56 = vld [vmem:[%s3229_s23 + $0x170] sm:$0xf0]  ;;  %v2017_v57 = vld [vmem:[%s3229_s23 + $0x160] sm:$0xf]  ;;  %v1890_v59 = vor.u32 %v2163_v51, %v1889_v50  ;;  %v1894_v60 = vor.u32 %v2161_v52, %v1891_v54 }
 0x15c   : > { %1224 = vmatpush.bf16.msra.mxu3 %v2054_v37  ;;  %1198 = vmatpush.bf16.msra.mxu1 %v2050_v41  ;;  %v2195_v58 = vld [vmem:[%s3229_s23 + $0x16c] sm:$0xf0]  ;;  %v2022_v61 = vor.u32 %v2193_v55, %v2019_v56  ;;  %v1873_v62 = vld [vmem:[%s3229_s23 + $0x40] sm:$0xf]  ;;  %v2157_v0 = vld [vmem:[%s3229_s23 + $0x44] sm:$0xf] }
 0x15d   : > { %v2159_v63 = vld [vmem:[%s3229_s23 + $0x4c] sm:$0xf0]  ;;  %v2018_v1 = vor.u32 %v2195_v58, %v2017_v57  ;;  %v1875_v2 = vld [vmem:[%s3229_s23 + $0x50] sm:$0xf0]  ;;  %v2189_v3 = vld [vmem:[%s3229_s23 + $0x144] sm:$0xf] }
 0x15e   : > { %1186 = vmatpush.bf16.msra.mxu0 %v1906_v47  ;;  %v2003_v4 = vld [vmem:[%s3229_s23 + $0x150] sm:$0xf0]  ;;  %v2001_v5 = vld [vmem:[%s3229_s23 + $0x140] sm:$0xf]  ;;  %v2191_v6 = vld [vmem:[%s3229_s23 + $0x14c] sm:$0xf0]  ;;  %v1874_v7 = vor.u32 %v2159_v63, %v1873_v62  ;;  %v1878_v8 = vor.u32 %v2157_v0, %v1875_v2 }
 0x15f   : > { %1212 = vmatpush.bf16.msra.mxu2 %v1910_v48  ;;  %v2006_v9 = vor.u32 %v2189_v3, %v2003_v4  ;;  %v1857_v10 = vld [vmem:[%s3229_s23 + $0x20] sm:$0xf]  ;;  %v2155_v11 = vld [vmem:[%s3229_s23 + $0x2c] sm:$0xf0]  ;;  %v2153_v12 = vld [vmem:[%s3229_s23 + $0x24] sm:$0xf]  ;;  %v2002_v13 = vor.u32 %v2191_v6, %v2001_v5 }
 0x160   : > { %1225 = vmatpush.bf16.msra.mxu3 %v2038_v49  ;;  %1199 = vmatpush.bf16.msra.mxu1 %v2034_v53  ;;  %v1859_v14 = vld [vmem:[%s3229_s23 + $0x30] sm:$0xf0]  ;;  %v2185_v15 = vld [vmem:[%s3229_s23 + $0x124] sm:$0xf]  ;;  %v1985_v17 = vld [vmem:[%s3229_s23 + $0x120] sm:$0xf]  ;;  %v1858_v20 = vor.u32 %v2155_v11, %v1857_v10 }
 0x161   : > { %v1987_v16 = vld [vmem:[%s3229_s23 + $0x130] sm:$0xf0]  ;;  %v2187_v18 = vld [vmem:[%s3229_s23 + $0x12c] sm:$0xf0]  ;;  %v1841_v19 = vld [vmem:[%s3229_s23] sm:$0xf]  ;;  %v1862_v24 = vor.u32 %v2153_v12, %v1859_v14 }
 0x162   : > { %1187 = vmatpush.bf16.msra.mxu0 %v1890_v59  ;;  %v2151_v21 = vld [vmem:[%s3229_s23 + $0xc] sm:$0xf0]  ;;  %v2149_v22 = vld [vmem:[%s3229_s23 + $0x4] sm:$0xf]  ;;  %v1990_v25 = vor.u32 %v2185_v15, %v1987_v16  ;;  %v1843_v26 = vld [vmem:[%s3229_s23 + $0x10] sm:$0xf0]  ;;  %v1986_v30 = vor.u32 %v2187_v18, %v1985_v17 }
 0x163   : > { %1213 = vmatpush.bf16.msra.mxu2 %v1894_v60  ;;  %v778_v23 = vld [vmem:[%s3706_s0] sm:$0xff]  ;;  %v1971_v28 = vld [vmem:[%s3229_s23 + $0x110] sm:$0xf0]  ;;  %v2180_v32 = vld [vmem:[%s3229_s23 + $0xf4] sm:$0xf0]  ;;  %v1842_v36 = vor.u32 %v2151_v21, %v1841_v19  ;;  %v1846_v40 = vor.u32 %v2149_v22, %v1843_v26 }
 0x164   : > { %1226 = vmatpush.bf16.msra.mxu3 %v2022_v61  ;;  %1200 = vmatpush.bf16.msra.mxu1 %v2018_v1  ;;  %v2181_v27 = vld [vmem:[%s3229_s23 + $0x104] sm:$0xf]  ;;  %v779_v29 = vpack.c.bf16 %v778_v23, %v778_v23  ;;  %v1961_v31 = vld [vmem:[%s3229_s23 + $0xe8] sm:$0xf]  ;;  %v2178_v33 = vld [vmem:[%s3229_s23 + $0xec] sm:$0xf] }
 0x165   : > { %v1963_v34 = vld [vmem:[%s3229_s23 + $0xf8] sm:$0xf0]  ;;  %v2210_v35 = vld [vmem:[%s3229_s23 + $0x1ec] sm:$0xf]  ;;  %v1969_v38 = vld [vmem:[%s3229_s23 + $0x100] sm:$0xf]  ;;  %v1974_v41 = vor.u32 %v2181_v27, %v1971_v28  ;;  %v1962_v44 = vor.u32 %v2180_v32, %v1961_v31 }
 0x166   : > { %1188 = vmatpush.bf16.msra.mxu0 %v1874_v7  ;;  %780 = vst [vmem:[#allocation2 + $0x4] sm:$0xf] %v779_v29  ;;  %v2091_v37 = vld [vmem:[%s3229_s23 + $0x1f8] sm:$0xf0]  ;;  %v2183_v39 = vld [vmem:[%s3229_s23 + $0x10c] sm:$0xf0]  ;;  %v1966_v45 = vor.u32 %v2178_v33, %v1963_v34 }
 0x167   : > { %1214 = vmatpush.bf16.msra.mxu2 %v1878_v8  ;;  %v2089_v42 = vld [vmem:[%s3229_s23 + $0x1e8] sm:$0xf]  ;;  %v2212_v43 = vld [vmem:[%s3229_s23 + $0x1f4] sm:$0xf0]  ;;  %v2094_v47 = vor.u32 %v2210_v35, %v2091_v37  ;;  %v1970_v48 = vor.u32 %v2183_v39, %v1969_v38  ;;  %v2174_v50 = vld [vmem:[%s3229_s23 + $0xcc] sm:$0xf] }
 0x168   : > { %1227 = vmatpush.bf16.msra.mxu3 %v2006_v9  ;;  %1201 = vmatpush.bf16.msra.mxu1 %v2002_v13  ;;  %v1945_v46 = vld [vmem:[%s3229_s23 + $0xc8] sm:$0xf]  ;;  %v2176_v49 = vld [vmem:[%s3229_s23 + $0xd4] sm:$0xf0]  ;;  %v1947_v51 = vld [vmem:[%s3229_s23 + $0xd8] sm:$0xf0]  ;;  %v2090_v52 = vor.u32 %v2212_v43, %v2089_v42 }
 0x169   : > { %v2206_v53 = vld [vmem:[%s3229_s23 + $0x1cc] sm:$0xf]  ;;  %v2075_v54 = vld [vmem:[%s3229_s23 + $0x1d8] sm:$0xf0]  ;;  %v2073_v55 = vld [vmem:[%s3229_s23 + $0x1c8] sm:$0xf]  ;;  %v1946_v58 = vor.u32 %v2176_v49, %v1945_v46  ;;  %v1950_v59 = vor.u32 %v2174_v50, %v1947_v51 }
 0x16a   : > { %1189 = vmatpush.bf16.msra.mxu0 %v1858_v20  ;;  %v2208_v56 = vld [vmem:[%s3229_s23 + $0x1d4] sm:$0xf0]  ;;  %v1929_v60 = vld [vmem:[%s3229_s23 + $0xa8] sm:$0xf]  ;;  %v2170_v0 = vld [vmem:[%s3229_s23 + $0xac] sm:$0xf]  ;;  %v2078_v2 = vor.u32 %v2206_v53, %v2075_v54 }
 0x16b   : > { %1215 = vmatpush.bf16.msra.mxu2 %v1862_v24  ;;  %v2172_v63 = vld [vmem:[%s3229_s23 + $0xb4] sm:$0xf0]  ;;  %v1931_v1 = vld [vmem:[%s3229_s23 + $0xb8] sm:$0xf0]  ;;  %v2074_v3 = vor.u32 %v2208_v56, %v2073_v55  ;;  %v2202_v4 = vld [vmem:[%s3229_s23 + $0x1ac] sm:$0xf] }
 0x16c   : > { %1228 = vmatpush.bf16.msra.mxu3 %v1990_v25  ;;  %1202 = vmatpush.bf16.msra.mxu1 %v1986_v30  ;;  %v2059_v7 = vld [vmem:[%s3229_s23 + $0x1b8] sm:$0xf0]  ;;  %v2057_v8 = vld [vmem:[%s3229_s23 + $0x1a8] sm:$0xf]  ;;  %v2204_v9 = vld [vmem:[%s3229_s23 + $0x1b4] sm:$0xf0]  ;;  %v1930_v10 = vor.u32 %v2172_v63, %v1929_v60  ;;  %v1934_v11 = vor.u32 %v2170_v0, %v1931_v1 }
 0x16d   : > { %v781_v57 = vld [vmem:[#allocation2] sm:$0xff]  ;;  %v1913_v12 = vld [vmem:[%s3229_s23 + $0x88] sm:$0xf]  ;;  %v2168_v13 = vld [vmem:[%s3229_s23 + $0x94] sm:$0xf0]  ;;  %v2062_v16 = vor.u32 %v2202_v4, %v2059_v7  ;;  %v2058_v17 = vor.u32 %v2204_v9, %v2057_v8 }
 0x16e   : > { %1190 = vmatpush.bf16.msra.mxu0 %v1842_v36  ;;  %v857_v61 = vunpack.c.l.b16 %v781_v57  ;;  %v858_v62 = vunpack.c.h.b16 %v781_v57  ;;  %v2166_v14 = vld [vmem:[%s3229_s23 + $0x8c] sm:$0xf]  ;;  %v1915_v15 = vld [vmem:[%s3229_s23 + $0x98] sm:$0xf0]  ;;  %v2041_v20 = vld [vmem:[%s3229_s23 + $0x188] sm:$0xf]  ;;  %v1914_v22 = vor.u32 %v2168_v13, %v1913_v12 }
 0x16f   : > { %1216 = vmatpush.bf16.msra.mxu2 %v1846_v40  ;;  %v2198_v18 = vld [vmem:[%s3229_s23 + $0x18c] sm:$0xf]  ;;  %v2043_v19 = vld [vmem:[%s3229_s23 + $0x198] sm:$0xf0]  ;;  %v2200_v21 = vld [vmem:[%s3229_s23 + $0x194] sm:$0xf0]  ;;  %v1918_v23 = vor.u32 %v2166_v14, %v1915_v15 }
 0x170   : > { %1229 = vmatpush.bf16.msra.mxu3 %v1974_v41  ;;  %1203 = vmatpush.bf16.msra.mxu1 %v1970_v48  ;;  %v3430_v5 = vpack.c.b16 %v857_v61, %v857_v61  ;;  %v3432_v6 = vpack.c.b16 %v858_v62, %v858_v62  ;;  %v1897_v24 = vld [vmem:[%s3229_s23 + $0x68] sm:$0xf]  ;;  %v2164_v25 = vld [vmem:[%s3229_s23 + $0x74] sm:$0xf0]  ;;  %v2162_v26 = vld [vmem:[%s3229_s23 + $0x6c] sm:$0xf]  ;;  %v2046_v28 = vor.u32 %v2198_v18, %v2043_v19 }
 0x171   : > { %v1899_v27 = vld [vmem:[%s3229_s23 + $0x78] sm:$0xf0]  ;;  %v2042_v29 = vor.u32 %v2200_v21, %v2041_v20  ;;  %v2194_v30 = vld [vmem:[%s3229_s23 + $0x16c] sm:$0xf]  ;;  %v2025_v32 = vld [vmem:[%s3229_s23 + $0x168] sm:$0xf]  ;;  %v1898_v34 = vor.u32 %v2164_v25, %v1897_v24 }
 0x172   : > { %1235 = vmatpush.bf16.msrb.mxu0 %v1962_v44  ;;  %1217 = vmatmul.bf16.vlgmr.msra.gmra.mxu2 %v3430_v5  ;;  %v2027_v31 = vld [vmem:[%s3229_s23 + $0x178] sm:$0xf0]  ;;  %v2196_v33 = vld [vmem:[%s3229_s23 + $0x174] sm:$0xf0]  ;;  %v1902_v35 = vor.u32 %v2162_v26, %v1899_v27  ;;  %v1881_v36 = vld [vmem:[%s3229_s23 + $0x48] sm:$0xf] }
 0x173   : > { %1261 = vmatpush.bf16.msrb.mxu2 %v1966_v45  ;;  %1230 = vmatmul.bf16.vlgmr.msra.gmra.mxu3 %v3432_v6  ;;  %v2160_v37 = vld [vmem:[%s3229_s23 + $0x54] sm:$0xf0]  ;;  %v2158_v38 = vld [vmem:[%s3229_s23 + $0x4c] sm:$0xf]  ;;  %v1883_v39 = vld [vmem:[%s3229_s23 + $0x58] sm:$0xf0]  ;;  %v2030_v40 = vor.u32 %v2194_v30, %v2027_v31  ;;  %v2026_v41 = vor.u32 %v2196_v33, %v2025_v32 }
 0x174   : > { %1274 = vmatpush.bf16.msrb.mxu3 %v2094_v47  ;;  %1248 = vmatpush.bf16.msrb.mxu1 %v2090_v52  ;;  %v2190_v42 = vld [vmem:[%s3229_s23 + $0x14c] sm:$0xf]  ;;  %v2011_v43 = vld [vmem:[%s3229_s23 + $0x158] sm:$0xf0]  ;;  %v2009_v44 = vld [vmem:[%s3229_s23 + $0x148] sm:$0xf]  ;;  %v1882_v46 = vor.u32 %v2160_v37, %v1881_v36  ;;  %v1886_v47 = vor.u32 %v2158_v38, %v1883_v39 }
 0x175   : > { %1191 = vmatmul.bf16.vlgmr.msra.gmra.mxu0 %v3430_v5  ;;  %1204 = vmatmul.bf16.vlgmr.msra.gmra.mxu1 %v3432_v6  ;;  %v2192_v45 = vld [vmem:[%s3229_s23 + $0x154] sm:$0xf0]  ;;  %v1865_v48 = vld [vmem:[%s3229_s23 + $0x28] sm:$0xf]  ;;  %v2154_v50 = vld [vmem:[%s3229_s23 + $0x2c] sm:$0xf]  ;;  %v2014_v52 = vor.u32 %v2190_v42, %v2011_v43 }
 0x176   : > { %1236 = vmatpush.bf16.msrb.mxu0 %v1946_v58  ;;  %v2156_v49 = vld [vmem:[%s3229_s23 + $0x34] sm:$0xf0]  ;;  %v1867_v51 = vld [vmem:[%s3229_s23 + $0x38] sm:$0xf0]  ;;  %v2010_v53 = vor.u32 %v2192_v45, %v2009_v44  ;;  %v2186_v54 = vld [vmem:[%s3229_s23 + $0x12c] sm:$0xf] }
 0x177   : > { %1262 = vmatpush.bf16.msrb.mxu2 %v1950_v59  ;;  %v1995_v55 = vld [vmem:[%s3229_s23 + $0x138] sm:$0xf0]  ;;  %v1993_v56 = vld [vmem:[%s3229_s23 + $0x128] sm:$0xf]  ;;  %v2188_v57 = vld [vmem:[%s3229_s23 + $0x134] sm:$0xf0]  ;;  %v1866_v58 = vor.u32 %v2156_v49, %v1865_v48  ;;  %v1870_v59 = vor.u32 %v2154_v50, %v1867_v51 }
 0x178   : > { %1275 = vmatpush.bf16.msrb.mxu3 %v2078_v2  ;;  %1249 = vmatpush.bf16.msrb.mxu1 %v2074_v3  ;;  %v1849_v60 = vld [vmem:[%s3229_s23 + $0x8] sm:$0xf]  ;;  %v2152_v61 = vld [vmem:[%s3229_s23 + $0x14] sm:$0xf0]  ;;  %v2150_v62 = vld [vmem:[%s3229_s23 + $0xc] sm:$0xf]  ;;  %v1998_v0 = vor.u32 %v2186_v54, %v1995_v55  ;;  %v1994_v1 = vor.u32 %v2188_v57, %v1993_v56 }
 0x179   : > { %v1851_v63 = vld [vmem:[%s3229_s23 + $0x18] sm:$0xf0]  ;;  %v2182_v2 = vld [vmem:[%s3229_s23 + $0x10c] sm:$0xf]  ;;  %v1977_v4 = vld [vmem:[%s3229_s23 + $0x108] sm:$0xf]  ;;  %v1850_v8 = vor.u32 %v2152_v61, %v1849_v60 }
 0x17a   : > { %1237 = vmatpush.bf16.msrb.mxu0 %v1930_v10  ;;  %v1979_v3 = vld [vmem:[%s3229_s23 + $0x118] sm:$0xf0]  ;;  %v2184_v7 = vld [vmem:[%s3229_s23 + $0x114] sm:$0xf0]  ;;  %v1854_v9 = vor.u32 %v2150_v62, %v1851_v63  ;;  %v846_v12 = vld [vmem:[%s3232_s14] sm:$0xf] }
 0x17b   : > { %1263 = vmatpush.bf16.msrb.mxu2 %v1934_v11  ;;  %v1982_v10 = vor.u32 %v2182_v2, %v1979_v3  ;;  %v1978_v11 = vor.u32 %v2184_v7, %v1977_v4  ;;  %v848_v13 = vperm.slane %v846_v12, 0  ;;  %v850_v31 = vperm.slane %v846_v12, 2  ;;  %s3709_s23 = scalar_lea.vmem [#allocation10], %s3213_s16  ;;  %s3710_s14 = scalar_lea.vmem [#allocation19], %s3213_s16 }
 0x17c   : > { %1276 = vmatpush.bf16.msrb.mxu3 %v2062_v16  ;;  %1250 = vmatpush.bf16.msrb.mxu1 %v2058_v17  ;;  %v849_v16 = vperm.slane %v846_v12, 1  ;;  %v851_v44 = vperm.slane %v846_v12, 3  ;;  %v1345_v61 = vld [vmem:[%s3709_s23] sm:$0xff] }
 0x17e   : > { %1238 = vmatpush.bf16.msrb.mxu0 %v1914_v22 }
 0x17f   : > { %1264 = vmatpush.bf16.msrb.mxu2 %v1918_v23 }
 0x180   : > { %1277 = vmatpush.bf16.msrb.mxu3 %v2046_v28  ;;  %1251 = vmatpush.bf16.msrb.mxu1 %v2042_v29 }
 0x182   : > { %1239 = vmatpush.bf16.msrb.mxu0 %v1898_v34 }
 0x183   : > { %1265 = vmatpush.bf16.msrb.mxu2 %v1902_v35 }
 0x184   : > { %1278 = vmatpush.bf16.msrb.mxu3 %v2030_v40  ;;  %1252 = vmatpush.bf16.msrb.mxu1 %v2026_v41 }
 0x186   : > { %1240 = vmatpush.bf16.msrb.mxu0 %v1882_v46 }
 0x187   : > { %1266 = vmatpush.bf16.msrb.mxu2 %v1886_v47 }
 0x188   : > { %1279 = vmatpush.bf16.msrb.mxu3 %v2014_v52  ;;  %1253 = vmatpush.bf16.msrb.mxu1 %v2010_v53 }
 0x18a   : > { %1241 = vmatpush.bf16.msrb.mxu0 %v1866_v58 }
 0x18b   : > { %1267 = vmatpush.bf16.msrb.mxu2 %v1870_v59 }
 0x18c   : > { %1280 = vmatpush.bf16.msrb.mxu3 %v1998_v0  ;;  %1254 = vmatpush.bf16.msrb.mxu1 %v1994_v1 }
 0x18e   : > { %1242 = vmatpush.bf16.msrb.mxu0 %v1850_v8 }
 0x18f   : > { %1268 = vmatpush.bf16.msrb.mxu2 %v1854_v9 }
 0x190   : > { %1281 = vmatpush.bf16.msrb.mxu3 %v1982_v10  ;;  %1255 = vmatpush.bf16.msrb.mxu1 %v1978_v11 }
 0x191   : > { %1243 = vmatmul.bf16.vlgmr.msrb.gmra.mxu0 %v3430_v5 }
 0x192   : > { %1269 = vmatmul.bf16.vlgmr.msrb.gmra.mxu2 %v3430_v5 }
 0x193   : > { %1282 = vmatmul.bf16.vlgmr.msrb.gmra.mxu3 %v3432_v6  ;;  %1256 = vmatmul.bf16.vlgmr.msrb.gmra.mxu1 %v3432_v6 }
 0x1f2   : > { %v1192_v14 = vpop.f32.mrf.mxu0  ;;  %v1205_v15 = vpop.f32.mrf.mxu1 }
 0x1f3   : > { %v1193_v17 = vadd.f32 %v1192_v14, %v848_v13 }
 0x1f5   : > { %v1206_v18 = vadd.f32 %v1205_v15, %v1193_v17  ;;  %v1218_v19 = vpop.f32.mrf.mxu2 }
 0x1f6   : > { %v1231_v20 = vpop.f32.mrf.mxu3  ;;  %v1219_v21 = vadd.f32 %v1218_v19, %v849_v16 }
 0x1f7   : > { %v2095_v22 = vmul.f32 -1.442695, %v1206_v18 }
 0x1f8   : > { %v1232_v23 = vadd.f32 %v1231_v20, %v1219_v21 }
 0x1f9   : > { %2335 = vpow2.f32 %v2095_v22 }
 0x1fa   : > { %v1194_v24 = vpop.f32.mrf.mxu0  ;;  %v1207_v25 = vpop.f32.mrf.mxu1  ;;  %v2096_v5 = vmul.f32 -1.442695, %v1232_v23 }
 0x1fc   : > { %2337 = vpow2.f32 %v2096_v5 }
 0x1fd   : > { %v1220_v26 = vpop.f32.mrf.mxu2 }
 0x1fe   : > { %v1233_v27 = vpop.f32.mrf.mxu3 }
 0x1ff   : > { %v2336_v6 = vpop.eup %2335 }
 0x200   : > { %v1290_v28 = vadd.f32 1.0, %v2336_v6 }
 0x202   : > { %2339 = vrcp.f32 %v1290_v28  ;;  %v2338_v29 = vpop.eup %2337  ;;  %v1302_v35 = vand.u32 2147483648, %v1290_v28  ;;  %vm1296_vm0 = vweird.f32 %v1290_v28  ;;  %v1300_v40 = vand.u32 2147483647, %v1290_v28 }
 0x203   : > { %v1309_v30 = vadd.f32 1.0, %v2338_v29 }
 0x204   : > { %v1303_v47 = vor.u32 1.1754944e-38, %v1302_v35  ;;  %vm1301_vm5 = vcmp.eq.f32.partialorder %v1300_v40, 8.507059e+37 }
 0x205   : > { %2341 = vrcp.f32 %v1309_v30  ;;  %vm1315_vm2 = vweird.f32 %v1309_v30  ;;  %v1321_v45 = vand.u32 2147483648, %v1309_v30  ;;  %v1319_v48 = vand.u32 2147483647, %v1309_v30 }
 0x207   : > { %v1322_v55 = vor.u32 1.1754944e-38, %v1321_v45  ;;  %vm1320_vm7 = vcmp.eq.f32.partialorder %v1319_v48, 8.507059e+37 }
 0x208   : > { %v2340_v32 = vpop.eup %2339 }
 0x209   : > { %v1292_v33 = vmul.f32 %v2340_v32, %v1290_v28  ;;  %vm1297_vm1 = vweird.f32 %v2340_v32 }
 0x20a   : > { %vm3486_vm3 = vmor %vm1296_vm0, %vm1297_vm1 }
 0x20b   : > { %v1293_v36 = vsub.f32 1.0, %v1292_v33  ;;  %v2342_v38 = vpop.eup %2341 }
 0x20c   : > { %v1311_v41 = vmul.f32 %v2342_v38, %v1309_v30  ;;  %vm1316_vm4 = vweird.f32 %v2342_v38 }
 0x20d   : > { %v1294_v43 = vmul.f32 %v2340_v32, %v1293_v36  ;;  %vm1317_vm6 = vmor %vm1315_vm2, %vm1316_vm4 }
 0x20e   : > { %v1244_v34 = vpop.f32.mrf.mxu0  ;;  %v1312_v49 = vsub.f32 1.0, %v1311_v41 }
 0x20f   : > { %v1245_v37 = vadd.f32 %v1244_v34, %v850_v31  ;;  %v1295_v50 = vadd.f32 %v2340_v32, %v1294_v43 }
 0x210   : > { %v1257_v39 = vpop.f32.mrf.mxu1  ;;  %v1313_v52 = vmul.f32 %v2342_v38, %v1312_v49 }
 0x211   : > { %v1258_v42 = vadd.f32 %v1257_v39, %v1245_v37  ;;  %v1299_v53 = vsel %vm3486_vm3, %v2340_v32, %v1295_v50 }
 0x212   : > { %v1304_v58 = vsel %vm1301_vm5, %v1303_v47, %v1299_v53  ;;  %v1314_v59 = vadd.f32 %v2342_v38, %v1313_v52 }
 0x213   : > { %2343 = vtanh.f32 %v1258_v42 }
 0x214   : > { %v1318_v0 = vsel %vm1317_vm6, %v2342_v38, %v1314_v59 }
 0x215   : > { %v1270_v51 = vpop.f32.mrf.mxu2  ;;  %v1323_v2 = vsel %vm1320_vm7, %v1322_v55, %v1318_v0 }
 0x216   : > { %v1271_v54 = vadd.f32 %v1270_v51, %v851_v44  ;;  %v1283_v56 = vpop.f32.mrf.mxu3  ;;  %v1246_v57 = vpop.f32.mrf.mxu0  ;;  %v1346_v4 = vmul.f32 %v1345_v61, %v1323_v2 }
 0x218   : > { %v1284_v60 = vadd.f32 %v1283_v56, %v1271_v54  ;;  %v1259_v62 = vpop.f32.mrf.mxu1 }
 0x219   : > { %v2344_v63 = vpop.eup %2343 }
 0x21a   : > { %v2097_v1 = vmul.f32 -1.442695, %v1284_v60  ;;  %v1347_v3 = vmul.f32 %v2344_v63, %v1304_v58 }
 0x21c   : > { %2345 = vpow2.f32 %v2097_v1  ;;  %v1348_v8 = vadd.f32 %v1347_v3, %v1346_v4 }
 0x21d   : > { %v1272_v7 = vpop.f32.mrf.mxu2 }
 0x21e   : > { %v1285_v9 = vpop.f32.mrf.mxu3  ;;  %1352 = vst [vmem:[%s3710_s14] sm:$0xff] %v1348_v8 }
 0x222   : > { %v2346_v10 = vpop.eup %2345 }
 0x223   : > { %v1329_v11 = vadd.f32 1.0, %v2346_v10 }
 0x225   : > { %2347 = vrcp.f32 %v1329_v11  ;;  %v1341_v15 = vand.u32 2147483648, %v1329_v11  ;;  %v1339_v17 = vand.u32 2147483647, %v1329_v11  ;;  %vm1335_vm9 = vweird.f32 %v1329_v11 }
 0x226   : > { %2349 = vtanh.f32 %v1348_v8 }
 0x227   : > { %v1342_v19 = vor.u32 1.1754944e-38, %v1341_v15  ;;  %vm1340_vm11 = vcmp.eq.f32.partialorder %v1339_v17, 8.507059e+37 }
 0x22b   : > { %v2348_v12 = vpop.eup %2347 }
 0x22c   : > { %v1331_v13 = vmul.f32 %v2348_v12, %v1329_v11  ;;  %vm1336_vm8 = vweird.f32 %v2348_v12  ;;  %v2350_v21 = vpop.eup %2349 }
 0x22d   : > { %vm1337_vm10 = vmor %vm1335_vm9, %vm1336_vm8 }
 0x22e   : > { %v1332_v14 = vsub.f32 1.0, %v1331_v13 }
 0x230   : > { %v1333_v16 = vmul.f32 %v2348_v12, %v1332_v14 }
 0x232   : > { %v1334_v18 = vadd.f32 %v2348_v12, %v1333_v16 }
 0x234   : > { %v1338_v20 = vsel %vm1337_vm10, %v2348_v12, %v1334_v18 }
 0x235   : > { %v1343_v22 = vsel %vm1340_vm11, %v1342_v19, %v1338_v20 }
 0x236   : > { %v1350_v23 = vmul.f32 %v2350_v21, %v1343_v22 }
 0x238   : > { %1351 = vst [vmem:[%s3711_s19] sm:$0xff] %v1350_v23  ;;  %v1353_v24 = vpack.c.bf16 %v1350_v23, %v1350_v23 }
 0x23a   : > { %1354 = vst [vmem:[#allocation2] sm:$0xf] %v1353_v24 }
 0x23b PF: > { %s3712_s1 = sld [smem:[#allocation57_spill]] }
 0x241   : > { %p2098_p1 = scmp.lt.s32.totalorder %s3712_s1, 2 }
 0x242   : > { %s3713_s12 = sld [smem:[#allocation75_spill]] (!%p2098_p1) }
 0x243   : > { %1358 = sbr.rel (%p2098_p1) target bundleno = 750 (0x2ee), region = 108 }
 0x248   : > { %v2220_v25 = vld [vmem:[%s3242_s11 + $0x38] sm:$0xff]  ;;  %v2219_v5 = vld [vmem:[%s3242_s11 + $0x30] sm:$0xff]  ;;  %v2218_v26 = vld [vmem:[%s3242_s11 + $0x28] sm:$0xff] }
 0x249   : > { %1428 = vmatpush.bf16.msra.mxu0 %v2220_v25  ;;  %v2217_v27 = vld [vmem:[%s3242_s11 + $0x20] sm:$0xff]  ;;  %v2216_v6 = vld [vmem:[%s3242_s11 + $0x18] sm:$0xff]  ;;  %v2215_v28 = vld [vmem:[%s3242_s11 + $0x10] sm:$0xff] }
 0x24a   : > { %v2214_v29 = vld [vmem:[%s3242_s11 + $0x8] sm:$0xff]  ;;  %v2213_v30 = vld [vmem:[%s3242_s11] sm:$0xff] }
 0x24b   : > { %v1359_v31 = vld [vmem:[#allocation2] sm:$0xf] }
 0x24c   : > { %v2351_v32 = vld [vmem:[%s3713_s12] ss:$0 sm:$0xff] }
 0x24d   : > { %1429 = vmatpush.bf16.msra.mxu0 %v2219_v5 }
 0x251   : > { %1430 = vmatpush.bf16.msra.mxu0 %v2218_v26 }
 0x255   : > { %1431 = vmatpush.bf16.msra.mxu0 %v2217_v27 }
 0x259   : > { %1432 = vmatpush.bf16.msra.mxu0 %v2216_v6 }
 0x25d   : > { %1433 = vmatpush.bf16.msra.mxu0 %v2215_v28 }
 0x261   : > { %1434 = vmatpush.bf16.msra.mxu0 %v2214_v29 }
 0x265   : > { %1435 = vmatpush.bf16.msra.mxu0 %v2213_v30 }
 0x268   : > { %1436 = vmatmul.bf16.vlgmr.msra.gmra.mxu0 %v1359_v31 }
 0x2e5   : > { %v1437_v33 = vpop.f32.mrf.mxu0 }
 0x2e6   : > { %v1438_v34 = vadd.f32 %v2351_v32, %v1437_v33 }
 0x2e8   : > { %1441 = vst [vmem:[%s3249_s26] sm:$0xff] %v1438_v34 }
 0x2ed   : > { %v1439_v35 = vpop.f32.mrf.mxu0 }
 0x2ee PF: > { %s3714_s4 = sld [smem:[#allocation57_spill]]  ;;  %s3715_s11 = scalar_lea.vmem [#allocation17], %s3213_s16 }
 0x2ef   : > { %s1484_s24 = sshll.u32 %s3715_s11, 4  ;;  %s3717_s27 = sld [smem:[#allocation77_spill]]  ;;  %s1485_s24 = int_to_ptr.vmem [resolvable:$true] %s1484_s24 }
 0x2f0   : > { %s1468_s30 = sshll.u32 %s3249_s26, 4  ;;  %s3719_s23 = sld [smem:[#allocation78_spill]]  ;;  %s1469_s30 = int_to_ptr.vmem [resolvable:$true] %s1468_s30 }
 0x2f1   : > { %s1448_s19 = scalar_lea.sflag [#allocation18], %s3221_s29 }
 0x2f4   : > { %p1477_p4 = scmp.lt.s32.totalorder %s3714_s4, 1  ;;  %s2134_s5 = sadd.s32 4294967294, %s3714_s4 }
 0x2f5   : > { %p3519_p11 = scmp.gt.s32.totalorder %s2134_s5, 0 }
 0x2f6   : > { %s1478_s8 = scalar_select %p1477_p4, %s3714_s4, 1 }
 0x2f7   : > { %s2726_s4 = scalar_lea.hbm %s3717_s27, 16 }
 0x2f8   : > { %s2136_s21 = sshll.u32 %s1478_s8, 3 }
 0x2f9   : > { %s1482_s10 = scalar_lea.hbm %s3717_s27, %s2136_s21  ;;  %s1498_s14 = scalar_lea.hbm %s3719_s23, %s2136_s21 }
 0x2fa   : > { %s1486_s20 = sshll.u32 %s1482_s10, 4  ;;  %s1487_s20 = int_to_ptr.hbm [resolvable:$true] %s1486_s20 }
 0x2fb   : > { %s2720_s1 = sshra.s32 %s1487_s20, 4  ;;  %s2721_s1 = int_to_ptr.hbm [resolvable:$true] %s2720_s1 }
 0x2fc   : > { %s2722_s9 = scalar_lea.hbm %s2721_s1, 8  ;;  %p2727_p8 = scmp.lt.s32.totalorder %s2721_s1, %s3717_s27 }
 0x2fd   : > { %p2723_p12 = scmp.ne.s32.totalorder %s2721_s1, %s2722_s9  ;;  %p2728_p13 = scmp.lt.s32.totalorder %s2726_s4, %s2722_s9 }
 0x2ff   : > { %p2724_p0 = pnand %p2723_p12, %p3056_p3  ;;  %p2729_p2 = por %p2728_p13, %p2727_p8 }
 0x301   : > { %p2725_p6 = pneg %p2724_p0 }
 0x303   : > { %p2730_p7 = pnand %p2729_p2, %p2725_p6 }
 0x305   : > { %2733 = shalt.err (!%p2730_p7)
}
 0x306   : > { %2232 = dma.vmem_to_hbm [thread:$0]  (%p3056_p3), %s1485_s24, 128, %s1487_s20, %s1448_s19  }
 0x307   : > { %s3720_s26 = sld [smem:[#allocation62_spill]]  ;;  %s3737_s5 = smov (!%p3519_p11, %s2134_s5), 0 }
 0x308   : > { %s3721_s21 = scalar_lea.vmem [#allocation19], %s3213_s16  ;;  %s1502_s6 = sshll.u32 %s1498_s14, 4  ;;  %s3550_s6 = int_to_ptr.hbm [resolvable:$true] %s1502_s6 }
 0x309   : > { %s3544_s28 = sshll.u32 %s3721_s21, 4  ;;  %s2135_s10 = sshll.u32 %s3737_s5, 3  ;;  %s1501_s28 = int_to_ptr.vmem [resolvable:$true] %s3544_s28 }
 0x30a   : > { %s3722_s1 = sld [smem:[#allocation76_spill]]  ;;  %s1443_s24 = scalar_lea.sflag [#allocation9], %s3239_s25 }
 0x30d   : > { %p3723_p9 = scmp.ne.s32.totalorder %s3720_s26, 0 }
 0x310   : > { %s1466_s9 = scalar_lea.hbm %s3722_s1, %s2135_s10  ;;  %s2754_s14 = scalar_lea.hbm %s3722_s1, 8 }
 0x311   : > { %s1470_s18 = sshll.u32 %s1466_s9, 4  ;;  %s1471_s18 = int_to_ptr.hbm [resolvable:$true] %s1470_s18 }
 0x312   : > { %s2748_s13 = sshra.s32 %s1471_s18, 4  ;;  %s2749_s13 = int_to_ptr.hbm [resolvable:$true] %s2748_s13 }
 0x313   : > { %s2750_s20 = scalar_lea.hbm %s2749_s13, 8  ;;  %p2755_p11 = scmp.lt.s32.totalorder %s2749_s13, %s3722_s1 }
 0x314   : > { %p2751_p5 = scmp.ne.s32.totalorder %s2749_s13, %s2750_s20  ;;  %p2756_p12 = scmp.lt.s32.totalorder %s2754_s14, %s2750_s20 }
 0x316   : > { %p2752_p1 = pnand %p2751_p5, %p3723_p9  ;;  %p2757_p0 = por %p2756_p12, %p2755_p11 }
 0x318   : > { %p2753_p4 = pneg %p2752_p1 }
 0x31a   : > { %p2758_p6 = pnand %p2757_p0, %p2753_p4 }
 0x31c   : > { %2761 = shalt.err (!%p2758_p6)
}
 0x31d   : > { %2231 = dma.vmem_to_hbm [thread:$0]  (%p3723_p9), %s1469_s30, 128, %s1471_s18, %s1443_s24  }
 0x31e   : > { %s2776_s25 = sshra.s32 %s3550_s6, 4  ;;  %s2782_s10 = scalar_lea.hbm %s3719_s23, 16  ;;  %s2777_s25 = int_to_ptr.hbm [resolvable:$true] %s2776_s25 }
 0x31f   : > { %s2778_s11 = scalar_lea.hbm %s2777_s25, 8  ;;  %p2783_p7 = scmp.lt.s32.totalorder %s2777_s25, %s3719_s23 }
 0x320   : > { %p2779_p8 = scmp.ne.s32.totalorder %s2777_s25, %s2778_s11  ;;  %p2784_p5 = scmp.lt.s32.totalorder %s2782_s10, %s2778_s11 }
 0x322   : > { %p2780_p13 = pnand %p2779_p8, %p3056_p3  ;;  %p2785_p1 = por %p2784_p5, %p2783_p7 }
 0x324   : > { %p2781_p2 = pneg %p2780_p13 }
 0x326   : > { %p2786_p4 = pnand %p2785_p1, %p2781_p2 }
 0x328   : > { %2789 = shalt.err (!%p2786_p4)
}
 0x329   : > { %2233 = dma.vmem_to_hbm [thread:$0]  (%p3056_p3), %s1501_s28, 128, %s3550_s6, %s1448_s19  }
 0x32a PF: > { %p2264_p9 = scmp.ge.s32.totalorder %s2886_s22, 2  ;;  %s1514_s30 = sand.u32 1, %s2862_s17  }
 0x32b   : > { %s1515_s26 = scalar_lea.sflag [#allocation9], %s1514_s30 }
 0x32c   : > { %p2254_p11 = pnand %p2264_p9, %p3181_p10 }
 0x32e   : > { %p2255_p12 = pneg %p2254_p11 }
 0x330   : > { %2853 = dma.done.wait (%p2255_p12), %s1515_s26, 128  }
 0x331   : > { %2855 = vsyncadd (%p2255_p12), %s1515_s26, 4294967168  ;;  %s3724_s9 = sld [smem:[#allocation65_spill]] }
 0x332   : > { %s3725_s3 = sld [smem:[#allocation66_spill]] }
 0x337   : > { %s1524_s18 = sand.u32 1, %s3724_s9  }
 0x338   : > { %p3726_p0 = scmp.ne.s32.totalorder %s3725_s3, 0  ;;  %s1525_s29 = scalar_lea.sflag [#allocation18], %s1524_s18 }
 0x33a   : > { %p2257_p6 = pnand %p2264_p9, %p3726_p0 }
 0x33c   : > { %p2258_p8 = pneg %p2257_p6 }
 0x33e   : > { %2857 = dma.done.wait (%p2258_p8), %s1525_s29, 256  }
 0x33f   : > { %2859 = vsyncadd (%p2258_p8), %s1525_s29, 4294967040  ;;  %s3727_s22 = sld [smem:[#allocation58_spill]] }
 0x340   : > { %s3728_s17 = sld [smem:[#allocation53_spill]] }
 0x341   : > { %s3729_s18 = sld [smem:[#allocation54_spill]] }
 0x342   : > { %s3730_s0 = sld [smem:[#allocation67_spill]] }
 0x343   : > { %s3731_s19 = sld [smem:[#allocation55_spill]] }
 0x344   : > { %s3732_s20 = sld [smem:[#allocation56_spill]] }
 0x345   : > { %s3733_s21 = sld [smem:[#allocation60_spill]]  ;;  %p41_p3 = scmp.ge.s32.totalorder %s3727_s22, 5  }
 0x347   :  { %43 = sbr.rel (!%p41_p3) target bundleno = 28 (0x1c), region = 245 }
 0x34c   :  { %1541 = vsyncpa [#allocation8], 1 }
 0x34d   :  { %1543 = vsyncpa [#allocation8 + $0x1], 1 }
 0x34e   :  { %1544 = vsyncpa [#allocation11], 1 }
 0x34f   :  { %1546 = vsyncpa [#allocation11 + $0x1], 1 }
 0x350   :  { %1547 = vsyncpa [#allocation14], 1 }
 0x351   :  { %1549 = vsyncpa [#allocation14 + $0x1], 1 }
 0x352   :  { %1550 = vsyncpa [#allocation9], 1 }
 0x353   :  { %1552 = vsyncpa [#allocation9 + $0x1], 1 }
 0x354   :  { %1553 = vsyncpa [#allocation18], 1 }
 0x355   :  { %1555 = vsyncpa [#allocation18 + $0x1], 1 }
 0x356   :  { %1556 = vsyncmov [#allocation4] }
 0x359   :  { %s1557_s15 = vpop.sfrf %1556 }
 0x35a   :  { %p2140_p10 = scmp.ne.s32.totalorder %s1557_s15, 0 }
 0x35c   :  { %1561 = shalt.err (%p2140_p10)  }
 0x35d   :  { %1563 = vsyncmov [#allocation4 + $0x1] }
 0x360   :  { %s1564_s28 = vpop.sfrf %1563 }
 0x361   :  { %p2141_p13 = scmp.ne.s32.totalorder %s1564_s28, 0 }
 0x363   :  { %1568 = shalt.err (%p2141_p13)  }
 0x364   :  { %1570 = vsyncmov [#allocation4 + $0x2] }
 0x367   :  { %s1571_s22 = vpop.sfrf %1570 }
 0x368   :  { %p2142_p2 = scmp.ne.s32.totalorder %s1571_s22, 0 }
 0x36a   :  { %1575 = shalt.err (%p2142_p2)  }
 0x36b   :  { %1577 = vsyncmov [#allocation4 + $0x3] }
 0x36e   :  { %s1578_s2 = vpop.sfrf %1577 }
 0x36f   :  { %p2143_p7 = scmp.ne.s32.totalorder %s1578_s2, 0 }
 0x371   :  { %1582 = shalt.err (%p2143_p7)  }
 0x372   :  { %1584 = vsyncmov [#allocation4 + $0x4] }
 0x375   :  { %s1585_s17 = vpop.sfrf %1584 }
 0x376   :  { %p2144_p5 = scmp.ne.s32.totalorder %s1585_s17, 0 }
 0x378   :  { %1589 = shalt.err (%p2144_p5)  }
 0x379   :  { %1591 = vsyncmov [#allocation4 + $0x5] }
 0x37c   :  { %s1592_s27 = vpop.sfrf %1591 }
 0x37d   :  { %p2145_p1 = scmp.ne.s32.totalorder %s1592_s27, 0 }
 0x37f   :  { %1596 = shalt.err (%p2145_p1)  }
 0x380   :  { %1598 = vsyncmov [#allocation4 + $0x6] }
 0x383   :  { %s1599_s23 = vpop.sfrf %1598 }
 0x384   :  { %p2146_p4 = scmp.ne.s32.totalorder %s1599_s23, 0 }
 0x386   :  { %1603 = shalt.err (%p2146_p4)  }
 0x387   :  { %1605 = vsyncmov [#allocation4 + $0x7] }
 0x38a   :  { %s1606_s19 = vpop.sfrf %1605 }
 0x38b   :  { %p2147_p9 = scmp.ne.s32.totalorder %s1606_s19, 0 }
 0x38d   :  { %1610 = shalt.err (%p2147_p9)  }

</bundles_post_ra>
